<compile_context>
chip_gen: v5e
topology: v5e:2x2
jax: 0.10.0
libtpu: 0.0.40
codegen_flags: <defaults>
</compile_context>

<pallas_src>
import functools

import jax
import jax.numpy as jnp
from jax import lax
from jax.experimental import pallas as pl
from jax.experimental.pallas import tpu as pltpu


# ----------------------------------------------------------------------------
# Kernel
# ----------------------------------------------------------------------------
def _bilstm_fused_kernel(x_ref, w_in_f_ref, w_in_b_ref, b_in_ref, w_hh_ref,
                         w_out_f_ref, w_out_b_ref, b_out_ref, out_ref,
                         gx_sc, hist_sc):
    """Fused bidirectional LSTM + Linear + Tanh.

    x_ref      : (T, B, Din)   bf16, time-major input
    w_in_f_ref : (Din, 8H)     bf16, fwd-direction input weights (bwd cols zero)
    w_in_b_ref : (Din, 8H)     bf16, bwd-direction input weights (fwd cols zero)
    b_in_ref   : (1, 8H)       f32,  b_ih + b_hh, both directions
    w_hh_ref   : (2H, 8H)      f32,  block-diagonal recurrent weights [h_f | h_b]
    w_out_f_ref: (2H, Doutp)   bf16, Linear weights for fwd hidden (bottom H rows zero)
    w_out_b_ref: (2H, Doutp)   bf16, Linear weights for bwd hidden (top H rows zero)
    b_out_ref  : (1, Doutp)    f32
    out_ref    : (T, B, Doutp) f32
    gx_sc      : (T, B, 8H)    f32 scratch, gate inputs (bwd time-reversal baked in)
    hist_sc    : (T, B, 2H)    f32 scratch, per-step stacked hidden [h_f(i) | h_b(T-1-i)]

    Gate column layout (blocks of width H): [i_f,i_b, f_f,f_b, o_f,o_b, g_f,g_b].
    """
    T, B, _ = x_ref.shape
    G = gx_sc.shape[-1]          # 8H
    H2 = hist_sc.shape[-1]       # 2H

    # --- Prologue (off the serial chain): per-time input projection for both
    # directions.  Backward time reversal is handled by reading x[T-1-t]; the
    # two weight matrices have zeros in the other direction's columns, so every
    # store is a full-width (B, 8H) tile store.
    w_in_f = w_in_f_ref[...]
    w_in_b = w_in_b_ref[...]
    b_in = b_in_ref[...]
    for t in range(T):
        gx_sc[t] = (
            jnp.dot(x_ref[t], w_in_f, preferred_element_type=jnp.float32)
            + jnp.dot(x_ref[T - 1 - t], w_in_b, preferred_element_type=jnp.float32)
            + b_in)

    # --- Serial recurrence: step i handles forward time i and backward time
    # T-1-i with one block-diagonal recurrent matmul on the stacked (B, 2H) state.
    w_hh = w_hh_ref[...]
    # Constant lane mask: tanh on the g-gate block [6H:8H), sigmoid elsewhere.
    tanh_mask = lax.broadcasted_iota(jnp.int32, (B, G), 1) >= 3 * H2

    def step(i, carry):
        h, c = carry
        gates = gx_sc[i] + jnp.dot(h, w_hh, preferred_element_type=jnp.float32)
        # Full-width activations + per-lane select (no sub-vreg activation slices).
        act = jnp.where(tanh_mask, jnp.tanh(gates), jax.nn.sigmoid(gates))
        i2 = act[:, 0:H2]
        f2 = act[:, H2:2 * H2]
        o2 = act[:, 2 * H2:3 * H2]
        g2 = act[:, 3 * H2:4 * H2]
        c_new = f2 * c + i2 * g2            # (B, 2H) = [c_f | c_b]
        h_new = o2 * jnp.tanh(c_new)        # (B, 2H) = [h_f | h_b]
        hist_sc[i] = h_new                  # one full-width store per step
        return (h_new, c_new)

    zeros = jnp.zeros((B, H2), jnp.float32)  # init_hidden(): zero (h0, c0)
    lax.fori_loop(0, T, step, (zeros, zeros), unroll=True)

    # --- Epilogue (off the serial chain): fwd/bwd time realignment folded into
    # the two zero-padded output-weight halves; Linear + Tanh; lane-dense store.
    w_of = w_out_f_ref[...]
    w_ob = w_out_b_ref[...]
    b_out = b_out_ref[...]
    for t in range(T):
        hf = hist_sc[t].astype(w_of.dtype)          # fwd hidden at time t
        hb = hist_sc[T - 1 - t].astype(w_ob.dtype)  # bwd hidden at time t
        lin = (jnp.dot(hf, w_of, preferred_element_type=jnp.float32)
               + jnp.dot(hb, w_ob, preferred_element_type=jnp.float32)
               + b_out)
        out_ref[t] = jnp.tanh(lin).astype(out_ref.dtype)


# ----------------------------------------------------------------------------
# Wrapper (minimal glue: one input transpose, one output slice+transpose)
# ----------------------------------------------------------------------------
def generator_rnn_forward(x_ncl, packed):
    """x_ncl: (B, in_features, seq_len).  Initial (h0, c0) assumed zero."""
    B, Din, T = x_ncl.shape
    G = packed['w_in_f'].shape[1]        # 8H
    H2 = packed['w_hh'].shape[0]         # 2H
    Doutp = packed['w_out_f'].shape[1]   # padded output width
    Dout = packed['out_features']

    # Single input layout op: NCL -> (T, B, Din), bf16 for the MXU prologue GEMM.
    x_tbd = jnp.transpose(x_ncl, (2, 0, 1)).astype(jnp.bfloat16)

    vmem = pl.BlockSpec(memory_space=pltpu.MemorySpace.VMEM)
    out3 = pl.pallas_call(
        _bilstm_fused_kernel,
        out_shape=jax.ShapeDtypeStruct((T, B, Doutp), jnp.float32),
        in_specs=[vmem] * 8,
        out_specs=vmem,
        scratch_shapes=[
            pltpu.VMEM((T, B, G), jnp.float32),    # gate inputs (bwd reversed)
            pltpu.VMEM((T, B, H2), jnp.float32),   # stacked hidden history
        ],
    )(x_tbd, packed['w_in_f'], packed['w_in_b'], packed['b_in'],
      packed['w_hh'], packed['w_out_f'], packed['w_out_b'], packed['b_out'])

    # Single output layout op: (T, B, Doutp) -> (B, Dout, T)  (== lin_out.permute(0,2,1))
    return jnp.transpose(out3[:, :, :Dout], (1, 2, 0))


def pack_params(raw):
    """Pack PyTorch-layout LSTM/Linear params into the kernel's fused layout."""
    w_ih, w_hh = raw['w_ih'], raw['w_hh']       # (2, 4H, Din), (2, 4H, H)
    b = raw['b_ih'] + raw['b_hh']               # (2, 4H)
    w_out, b_out = raw['w_out'], raw['b_out']   # (Dout, 2H), (Dout,)
    H = w_hh.shape[-1]
    Din = w_ih.shape[-1]
    Dout = w_out.shape[0]
    Doutp = ((Dout + 127) // 128) * 128         # lane-dense padded output width

    # Target gate-column layout (blocks of width H):
    #   [i_f, i_b, f_f, f_b, o_f, o_b, g_f, g_b]
    # PyTorch row-block order is (i, f, g, o); target per-direction order (i, f, o, g).
    gate_src = (0, 1, 3, 2)

    w_in_f = jnp.zeros((Din, 8 * H), jnp.float32)   # fwd cols filled, bwd cols zero
    w_in_b = jnp.zeros((Din, 8 * H), jnp.float32)   # bwd cols filled, fwd cols zero
    w_hh_bd = jnp.zeros((2 * H, 8 * H), jnp.float32)
    b_all = jnp.zeros((8 * H,), jnp.float32)
    for s, g in enumerate(gate_src):
        rows = slice(g * H, (g + 1) * H)
        for d in range(2):                       # 0 = forward, 1 = backward
            cb = 2 * s + d
            cols = slice(cb * H, (cb + 1) * H)
            if d == 0:
                w_in_f = w_in_f.at[:, cols].set(w_ih[d, rows, :].T)
            else:
                w_in_b = w_in_b.at[:, cols].set(w_ih[d, rows, :].T)
            w_hh_bd = w_hh_bd.at[d * H:(d + 1) * H, cols].set(w_hh[d, rows, :].T)
            b_all = b_all.at[cols].set(b[d, rows])

    # Output projection split into fwd/bwd halves (other half's rows zeroed) so
    # the epilogue realigns the backward direction without any lane slicing.
    w_out_t = jnp.asarray(w_out, jnp.float32).T              # (2H, Dout)
    w_out_f = jnp.zeros((2 * H, Doutp), jnp.float32).at[0:H, 0:Dout].set(w_out_t[0:H])
    w_out_b = jnp.zeros((2 * H, Doutp), jnp.float32).at[H:2 * H, 0:Dout].set(w_out_t[H:])
    b_out_p = jnp.zeros((Doutp,), jnp.float32).at[0:Dout].set(
        jnp.asarray(b_out, jnp.float32))

    return {
        'w_in_f': w_in_f.astype(jnp.bfloat16),
        'w_in_b': w_in_b.astype(jnp.bfloat16),
        'b_in': b_all.reshape(1, 8 * H),
        'w_hh': w_hh_bd,                                     # f32 on the serial chain
        'w_out_f': w_out_f.astype(jnp.bfloat16),
        'w_out_b': w_out_b.astype(jnp.bfloat16),
        'b_out': b_out_p.reshape(1, Doutp),
        'out_features': int(Dout),
    }


def init_raw_params(key, in_features, hidden_dim, out_features):
    """PyTorch-layout params, uniform +-1/sqrt(H) (like nn.LSTM defaults)."""
    H = hidden_dim
    ks = jax.random.split(key, 6)
    scale = 1.0 / jnp.sqrt(jnp.float32(H))

    def u(k, shape):
        return jax.random.uniform(k, shape, jnp.float32, -scale, scale)

    return {
        'w_ih': u(ks[0], (2, 4 * H, in_features)),
        'w_hh': u(ks[1], (2, 4 * H, H)),
        'b_ih': u(ks[2], (2, 4 * H)),
        'b_hh': u(ks[3], (2, 4 * H)),
        'w_out': u(ks[4], (out_features, 2 * H)),
        'b_out': u(ks[5], (out_features,)),
    }


# ----------------------------------------------------------------------------
# Pure-JAX reference (mirrors nn.LSTM(bidirectional) + Linear + Tanh + permutes)
# ----------------------------------------------------------------------------
def reference_forward(x_ncl, params):
    w_ih, w_hh = params['w_ih'], params['w_hh']
    b = params['b_ih'] + params['b_hh']
    w_out, b_out = params['w_out'], params['b_out']
    B, Din, T = x_ncl.shape
    H = w_hh.shape[-1]
    x = jnp.transpose(x_ncl, (2, 0, 1)).astype(jnp.float32)   # (T, B, Din)

    def run(d, xs):
        def step(carry, x_t):
            h, c = carry
            gates = x_t @ w_ih[d].T + h @ w_hh[d].T + b[d]
            i_g = jax.nn.sigmoid(gates[:, 0 * H:1 * H])
            f_g = jax.nn.sigmoid(gates[:, 1 * H:2 * H])
            g_g = jnp.tanh(gates[:, 2 * H:3 * H])
            o_g = jax.nn.sigmoid(gates[:, 3 * H:4 * H])
            c = f_g * c + i_g * g_g
            h = o_g * jnp.tanh(c)
            return (h, c), h

        init = (jnp.zeros((B, H), jnp.float32), jnp.zeros((B, H), jnp.float32))
        _, hs = lax.scan(step, init, xs)
        return hs                                              # (T, B, H)

    h_f = run(0, x)
    h_b = run(1, x[::-1])[::-1]
    rnn = jnp.concatenate([h_f, h_b], axis=-1)                 # (T, B, 2H)
    lin = jnp.tanh(rnn @ w_out.T + b_out)                      # (T, B, Dout)
    return jnp.transpose(lin, (1, 2, 0))                       # (B, Dout, T)


# ----------------------------------------------------------------------------
if __name__ == "__main__":
    # Small shapes consistent with the module's forward.
    B = 2             # batch_size
    IN_FEAT = 4       # in_features
    SEQ = 8           # LEN_SAMPLES (seq_len)
    HID = 32          # hidden_dim
    OUT_FEAT = 4      # out_features

    key = jax.random.PRNGKey(0)
    k_x, k_p = jax.random.split(key)

    x = jax.random.normal(k_x, (B, IN_FEAT, SEQ), jnp.float32)   # NCL input
    raw = init_raw_params(k_p, IN_FEAT, HID, OUT_FEAT)
    packed = pack_params(raw)

    fwd = jax.jit(functools.partial(generator_rnn_forward, packed=packed))
    out = jax.block_until_ready(fwd(x))

    assert out.shape == (B, OUT_FEAT, SEQ), out.shape
    assert bool(jnp.all(jnp.isfinite(out)))

    # Correctness check against a pure-JAX LSTM reference.
    with jax.default_matmul_precision("highest"):
        ref = jax.block_until_ready(
            jax.jit(functools.partial(reference_forward, params=raw))(x))
    max_err = float(jnp.max(jnp.abs(out - ref)))
    assert max_err < 2e-2, f"mismatch vs reference: {max_err}"

    print("KERNEL_OK")
</pallas_src>

<mosaic_0001>
module attributes {stable_mosaic.version = 11 : i64} {
  func.func @_bilstm_fused_kernel(%arg0: memref<8x2x4xbf16, #tpu.memory_space<vmem>>, %arg1: memref<4x256xbf16, #tpu.memory_space<vmem>>, %arg2: memref<4x256xbf16, #tpu.memory_space<vmem>>, %arg3: memref<1x256xf32, #tpu.memory_space<vmem>>, %arg4: memref<64x256xf32, #tpu.memory_space<vmem>>, %arg5: memref<64x128xbf16, #tpu.memory_space<vmem>>, %arg6: memref<64x128xbf16, #tpu.memory_space<vmem>>, %arg7: memref<1x128xf32, #tpu.memory_space<vmem>>, %arg8: memref<8x2x128xf32, #tpu.memory_space<vmem>>, %arg9: memref<8x2x256xf32, #tpu.memory_space<vmem>>, %arg10: memref<8x2x64xf32, #tpu.memory_space<vmem>>) attributes {dimension_semantics = [], scalar_prefetch = 0 : i64, scratch_operands = 2 : i64, tpu.core_type = #tpu.core_type<tc>} {
    %c0 = arith.constant 0 : index
    %c0_0 = arith.constant 0 : index
    %0 = vector.load %arg1[%c0, %c0_0] : memref<4x256xbf16, #tpu.memory_space<vmem>>, vector<4x256xbf16>
    %c0_1 = arith.constant 0 : index
    %c0_2 = arith.constant 0 : index
    %1 = vector.load %arg2[%c0_1, %c0_2] : memref<4x256xbf16, #tpu.memory_space<vmem>>, vector<4x256xbf16>
    %c0_3 = arith.constant 0 : index
    %c0_4 = arith.constant 0 : index
    %2 = vector.load %arg3[%c0_3, %c0_4] : memref<1x256xf32, #tpu.memory_space<vmem>>, vector<1x256xf32>
    %c0_5 = arith.constant 0 : index
    %c0_6 = arith.constant 0 : index
    %c0_7 = arith.constant 0 : index
    %3 = vector.load %arg0[%c0_5, %c0_6, %c0_7] : memref<8x2x4xbf16, #tpu.memory_space<vmem>>, vector<1x2x4xbf16>
    %4 = vector.shape_cast %3 : vector<1x2x4xbf16> to vector<2x4xbf16>
    %cst = arith.constant dense<0.000000e+00> : vector<2x256xf32>
    %5 = tpu.matmul %4, %0, %cst {dimension_numbers = #tpu.dot_dimension_numbers<[1], [0], [0], [1], [0, 0, 1, 1], [], []>} : vector<2x4xbf16>, vector<4x256xbf16>, vector<2x256xf32> -> vector<2x256xf32>
    %c7 = arith.constant 7 : index
    %c0_8 = arith.constant 0 : index
    %c0_9 = arith.constant 0 : index
    %6 = vector.load %arg0[%c7, %c0_8, %c0_9] : memref<8x2x4xbf16, #tpu.memory_space<vmem>>, vector<1x2x4xbf16>
    %7 = vector.shape_cast %6 : vector<1x2x4xbf16> to vector<2x4xbf16>
    %cst_10 = arith.constant dense<0.000000e+00> : vector<2x256xf32>
    %8 = tpu.matmul %7, %1, %cst_10 {dimension_numbers = #tpu.dot_dimension_numbers<[1], [0], [0], [1], [0, 0, 1, 1], [], []>} : vector<2x4xbf16>, vector<4x256xbf16>, vector<2x256xf32> -> vector<2x256xf32>
    %9 = arith.addf %5, %8 : vector<2x256xf32>
    %10 = vector.broadcast %2 : vector<1x256xf32> to vector<2x256xf32>
    %11 = arith.addf %9, %10 : vector<2x256xf32>
    %c0_11 = arith.constant 0 : index
    %c0_12 = arith.constant 0 : index
    %c0_13 = arith.constant 0 : index
    %12 = vector.load %arg9[%c0_11, %c0_12, %c0_13] : memref<8x2x256xf32, #tpu.memory_space<vmem>>, vector<1x2x256xf32>
    %13 = vector.shape_cast %12 : vector<1x2x256xf32> to vector<2x256xf32>
    %14 = vector.shape_cast %11 : vector<2x256xf32> to vector<1x2x256xf32>
    tpu.vector_store %arg9[%c0_11, %c0_12, %c0_13], %14 {strides = array<i32>} : memref<8x2x256xf32, #tpu.memory_space<vmem>>, vector<1x2x256xf32>,
    %c1 = arith.constant 1 : index
    %c0_14 = arith.constant 0 : index
    %c0_15 = arith.constant 0 : index
    %15 = vector.load %arg0[%c1, %c0_14, %c0_15] : memref<8x2x4xbf16, #tpu.memory_space<vmem>>, vector<1x2x4xbf16>
    %16 = vector.shape_cast %15 : vector<1x2x4xbf16> to vector<2x4xbf16>
    %cst_16 = arith.constant dense<0.000000e+00> : vector<2x256xf32>
    %17 = tpu.matmul %16, %0, %cst_16 {dimension_numbers = #tpu.dot_dimension_numbers<[1], [0], [0], [1], [0, 0, 1, 1], [], []>} : vector<2x4xbf16>, vector<4x256xbf16>, vector<2x256xf32> -> vector<2x256xf32>
    %c6 = arith.constant 6 : index
    %c0_17 = arith.constant 0 : index
    %c0_18 = arith.constant 0 : index
    %18 = vector.load %arg0[%c6, %c0_17, %c0_18] : memref<8x2x4xbf16, #tpu.memory_space<vmem>>, vector<1x2x4xbf16>
    %19 = vector.shape_cast %18 : vector<1x2x4xbf16> to vector<2x4xbf16>
    %cst_19 = arith.constant dense<0.000000e+00> : vector<2x256xf32>
    %20 = tpu.matmul %19, %1, %cst_19 {dimension_numbers = #tpu.dot_dimension_numbers<[1], [0], [0], [1], [0, 0, 1, 1], [], []>} : vector<2x4xbf16>, vector<4x256xbf16>, vector<2x256xf32> -> vector<2x256xf32>
    %21 = arith.addf %17, %20 : vector<2x256xf32>
    %22 = vector.broadcast %2 : vector<1x256xf32> to vector<2x256xf32>
    %23 = arith.addf %21, %22 : vector<2x256xf32>
    %c1_20 = arith.constant 1 : index
    %c0_21 = arith.constant 0 : index
    %c0_22 = arith.constant 0 : index
    %24 = vector.load %arg9[%c1_20, %c0_21, %c0_22] : memref<8x2x256xf32, #tpu.memory_space<vmem>>, vector<1x2x256xf32>
    %25 = vector.shape_cast %24 : vector<1x2x256xf32> to vector<2x256xf32>
    %26 = vector.shape_cast %23 : vector<2x256xf32> to vector<1x2x256xf32>
    tpu.vector_store %arg9[%c1_20, %c0_21, %c0_22], %26 {strides = array<i32>} : memref<8x2x256xf32, #tpu.memory_space<vmem>>, vector<1x2x256xf32>,
    %c2 = arith.constant 2 : index
    %c0_23 = arith.constant 0 : index
    %c0_24 = arith.constant 0 : index
    %27 = vector.load %arg0[%c2, %c0_23, %c0_24] : memref<8x2x4xbf16, #tpu.memory_space<vmem>>, vector<1x2x4xbf16>
    %28 = vector.shape_cast %27 : vector<1x2x4xbf16> to vector<2x4xbf16>
    %cst_25 = arith.constant dense<0.000000e+00> : vector<2x256xf32>
    %29 = tpu.matmul %28, %0, %cst_25 {dimension_numbers = #tpu.dot_dimension_numbers<[1], [0], [0], [1], [0, 0, 1, 1], [], []>} : vector<2x4xbf16>, vector<4x256xbf16>, vector<2x256xf32> -> vector<2x256xf32>
    %c5 = arith.constant 5 : index
    %c0_26 = arith.constant 0 : index
    %c0_27 = arith.constant 0 : index
    %30 = vector.load %arg0[%c5, %c0_26, %c0_27] : memref<8x2x4xbf16, #tpu.memory_space<vmem>>, vector<1x2x4xbf16>
    %31 = vector.shape_cast %30 : vector<1x2x4xbf16> to vector<2x4xbf16>
    %cst_28 = arith.constant dense<0.000000e+00> : vector<2x256xf32>
    %32 = tpu.matmul %31, %1, %cst_28 {dimension_numbers = #tpu.dot_dimension_numbers<[1], [0], [0], [1], [0, 0, 1, 1], [], []>} : vector<2x4xbf16>, vector<4x256xbf16>, vector<2x256xf32> -> vector<2x256xf32>
    %33 = arith.addf %29, %32 : vector<2x256xf32>
    %34 = vector.broadcast %2 : vector<1x256xf32> to vector<2x256xf32>
    %35 = arith.addf %33, %34 : vector<2x256xf32>
    %c2_29 = arith.constant 2 : index
    %c0_30 = arith.constant 0 : index
    %c0_31 = arith.constant 0 : index
    %36 = vector.load %arg9[%c2_29, %c0_30, %c0_31] : memref<8x2x256xf32, #tpu.memory_space<vmem>>, vector<1x2x256xf32>
    %37 = vector.shape_cast %36 : vector<1x2x256xf32> to vector<2x256xf32>
    %38 = vector.shape_cast %35 : vector<2x256xf32> to vector<1x2x256xf32>
    tpu.vector_store %arg9[%c2_29, %c0_30, %c0_31], %38 {strides = array<i32>} : memref<8x2x256xf32, #tpu.memory_space<vmem>>, vector<1x2x256xf32>,
    %c3 = arith.constant 3 : index
    %c0_32 = arith.constant 0 : index
    %c0_33 = arith.constant 0 : index
    %39 = vector.load %arg0[%c3, %c0_32, %c0_33] : memref<8x2x4xbf16, #tpu.memory_space<vmem>>, vector<1x2x4xbf16>
    %40 = vector.shape_cast %39 : vector<1x2x4xbf16> to vector<2x4xbf16>
    %cst_34 = arith.constant dense<0.000000e+00> : vector<2x256xf32>
    %41 = tpu.matmul %40, %0, %cst_34 {dimension_numbers = #tpu.dot_dimension_numbers<[1], [0], [0], [1], [0, 0, 1, 1], [], []>} : vector<2x4xbf16>, vector<4x256xbf16>, vector<2x256xf32> -> vector<2x256xf32>
    %c4 = arith.constant 4 : index
    %c0_35 = arith.constant 0 : index
    %c0_36 = arith.constant 0 : index
    %42 = vector.load %arg0[%c4, %c0_35, %c0_36] : memref<8x2x4xbf16, #tpu.memory_space<vmem>>, vector<1x2x4xbf16>
    %43 = vector.shape_cast %42 : vector<1x2x4xbf16> to vector<2x4xbf16>
    %cst_37 = arith.constant dense<0.000000e+00> : vector<2x256xf32>
    %44 = tpu.matmul %43, %1, %cst_37 {dimension_numbers = #tpu.dot_dimension_numbers<[1], [0], [0], [1], [0, 0, 1, 1], [], []>} : vector<2x4xbf16>, vector<4x256xbf16>, vector<2x256xf32> -> vector<2x256xf32>
    %45 = arith.addf %41, %44 : vector<2x256xf32>
    %46 = vector.broadcast %2 : vector<1x256xf32> to vector<2x256xf32>
    %47 = arith.addf %45, %46 : vector<2x256xf32>
    %c3_38 = arith.constant 3 : index
    %c0_39 = arith.constant 0 : index
    %c0_40 = arith.constant 0 : index
    %48 = vector.load %arg9[%c3_38, %c0_39, %c0_40] : memref<8x2x256xf32, #tpu.memory_space<vmem>>, vector<1x2x256xf32>
    %49 = vector.shape_cast %48 : vector<1x2x256xf32> to vector<2x256xf32>
    %50 = vector.shape_cast %47 : vector<2x256xf32> to vector<1x2x256xf32>
    tpu.vector_store %arg9[%c3_38, %c0_39, %c0_40], %50 {strides = array<i32>} : memref<8x2x256xf32, #tpu.memory_space<vmem>>, vector<1x2x256xf32>,
    %c4_41 = arith.constant 4 : index
    %c0_42 = arith.constant 0 : index
    %c0_43 = arith.constant 0 : index
    %51 = vector.load %arg0[%c4_41, %c0_42, %c0_43] : memref<8x2x4xbf16, #tpu.memory_space<vmem>>, vector<1x2x4xbf16>
    %52 = vector.shape_cast %51 : vector<1x2x4xbf16> to vector<2x4xbf16>
    %cst_44 = arith.constant dense<0.000000e+00> : vector<2x256xf32>
    %53 = tpu.matmul %52, %0, %cst_44 {dimension_numbers = #tpu.dot_dimension_numbers<[1], [0], [0], [1], [0, 0, 1, 1], [], []>} : vector<2x4xbf16>, vector<4x256xbf16>, vector<2x256xf32> -> vector<2x256xf32>
    %c3_45 = arith.constant 3 : index
    %c0_46 = arith.constant 0 : index
    %c0_47 = arith.constant 0 : index
    %54 = vector.load %arg0[%c3_45, %c0_46, %c0_47] : memref<8x2x4xbf16, #tpu.memory_space<vmem>>, vector<1x2x4xbf16>
    %55 = vector.shape_cast %54 : vector<1x2x4xbf16> to vector<2x4xbf16>
    %cst_48 = arith.constant dense<0.000000e+00> : vector<2x256xf32>
    %56 = tpu.matmul %55, %1, %cst_48 {dimension_numbers = #tpu.dot_dimension_numbers<[1], [0], [0], [1], [0, 0, 1, 1], [], []>} : vector<2x4xbf16>, vector<4x256xbf16>, vector<2x256xf32> -> vector<2x256xf32>
    %57 = arith.addf %53, %56 : vector<2x256xf32>
    %58 = vector.broadcast %2 : vector<1x256xf32> to vector<2x256xf32>
    %59 = arith.addf %57, %58 : vector<2x256xf32>
    %c4_49 = arith.constant 4 : index
    %c0_50 = arith.constant 0 : index
    %c0_51 = arith.constant 0 : index
    %60 = vector.load %arg9[%c4_49, %c0_50, %c0_51] : memref<8x2x256xf32, #tpu.memory_space<vmem>>, vector<1x2x256xf32>
    %61 = vector.shape_cast %60 : vector<1x2x256xf32> to vector<2x256xf32>
    %62 = vector.shape_cast %59 : vector<2x256xf32> to vector<1x2x256xf32>
    tpu.vector_store %arg9[%c4_49, %c0_50, %c0_51], %62 {strides = array<i32>} : memref<8x2x256xf32, #tpu.memory_space<vmem>>, vector<1x2x256xf32>,
    %c5_52 = arith.constant 5 : index
    %c0_53 = arith.constant 0 : index
    %c0_54 = arith.constant 0 : index
    %63 = vector.load %arg0[%c5_52, %c0_53, %c0_54] : memref<8x2x4xbf16, #tpu.memory_space<vmem>>, vector<1x2x4xbf16>
    %64 = vector.shape_cast %63 : vector<1x2x4xbf16> to vector<2x4xbf16>
    %cst_55 = arith.constant dense<0.000000e+00> : vector<2x256xf32>
    %65 = tpu.matmul %64, %0, %cst_55 {dimension_numbers = #tpu.dot_dimension_numbers<[1], [0], [0], [1], [0, 0, 1, 1], [], []>} : vector<2x4xbf16>, vector<4x256xbf16>, vector<2x256xf32> -> vector<2x256xf32>
    %c2_56 = arith.constant 2 : index
    %c0_57 = arith.constant 0 : index
    %c0_58 = arith.constant 0 : index
    %66 = vector.load %arg0[%c2_56, %c0_57, %c0_58] : memref<8x2x4xbf16, #tpu.memory_space<vmem>>, vector<1x2x4xbf16>
    %67 = vector.shape_cast %66 : vector<1x2x4xbf16> to vector<2x4xbf16>
    %cst_59 = arith.constant dense<0.000000e+00> : vector<2x256xf32>
    %68 = tpu.matmul %67, %1, %cst_59 {dimension_numbers = #tpu.dot_dimension_numbers<[1], [0], [0], [1], [0, 0, 1, 1], [], []>} : vector<2x4xbf16>, vector<4x256xbf16>, vector<2x256xf32> -> vector<2x256xf32>
    %69 = arith.addf %65, %68 : vector<2x256xf32>
    %70 = vector.broadcast %2 : vector<1x256xf32> to vector<2x256xf32>
    %71 = arith.addf %69, %70 : vector<2x256xf32>
    %c5_60 = arith.constant 5 : index
    %c0_61 = arith.constant 0 : index
    %c0_62 = arith.constant 0 : index
    %72 = vector.load %arg9[%c5_60, %c0_61, %c0_62] : memref<8x2x256xf32, #tpu.memory_space<vmem>>, vector<1x2x256xf32>
    %73 = vector.shape_cast %72 : vector<1x2x256xf32> to vector<2x256xf32>
    %74 = vector.shape_cast %71 : vector<2x256xf32> to vector<1x2x256xf32>
    tpu.vector_store %arg9[%c5_60, %c0_61, %c0_62], %74 {strides = array<i32>} : memref<8x2x256xf32, #tpu.memory_space<vmem>>, vector<1x2x256xf32>,
    %c6_63 = arith.constant 6 : index
    %c0_64 = arith.constant 0 : index
    %c0_65 = arith.constant 0 : index
    %75 = vector.load %arg0[%c6_63, %c0_64, %c0_65] : memref<8x2x4xbf16, #tpu.memory_space<vmem>>, vector<1x2x4xbf16>
    %76 = vector.shape_cast %75 : vector<1x2x4xbf16> to vector<2x4xbf16>
    %cst_66 = arith.constant dense<0.000000e+00> : vector<2x256xf32>
    %77 = tpu.matmul %76, %0, %cst_66 {dimension_numbers = #tpu.dot_dimension_numbers<[1], [0], [0], [1], [0, 0, 1, 1], [], []>} : vector<2x4xbf16>, vector<4x256xbf16>, vector<2x256xf32> -> vector<2x256xf32>
    %c1_67 = arith.constant 1 : index
    %c0_68 = arith.constant 0 : index
    %c0_69 = arith.constant 0 : index
    %78 = vector.load %arg0[%c1_67, %c0_68, %c0_69] : memref<8x2x4xbf16, #tpu.memory_space<vmem>>, vector<1x2x4xbf16>
    %79 = vector.shape_cast %78 : vector<1x2x4xbf16> to vector<2x4xbf16>
    %cst_70 = arith.constant dense<0.000000e+00> : vector<2x256xf32>
    %80 = tpu.matmul %79, %1, %cst_70 {dimension_numbers = #tpu.dot_dimension_numbers<[1], [0], [0], [1], [0, 0, 1, 1], [], []>} : vector<2x4xbf16>, vector<4x256xbf16>, vector<2x256xf32> -> vector<2x256xf32>
    %81 = arith.addf %77, %80 : vector<2x256xf32>
    %82 = vector.broadcast %2 : vector<1x256xf32> to vector<2x256xf32>
    %83 = arith.addf %81, %82 : vector<2x256xf32>
    %c6_71 = arith.constant 6 : index
    %c0_72 = arith.constant 0 : index
    %c0_73 = arith.constant 0 : index
    %84 = vector.load %arg9[%c6_71, %c0_72, %c0_73] : memref<8x2x256xf32, #tpu.memory_space<vmem>>, vector<1x2x256xf32>
    %85 = vector.shape_cast %84 : vector<1x2x256xf32> to vector<2x256xf32>
    %86 = vector.shape_cast %83 : vector<2x256xf32> to vector<1x2x256xf32>
    tpu.vector_store %arg9[%c6_71, %c0_72, %c0_73], %86 {strides = array<i32>} : memref<8x2x256xf32, #tpu.memory_space<vmem>>, vector<1x2x256xf32>,
    %c7_74 = arith.constant 7 : index
    %c0_75 = arith.constant 0 : index
    %c0_76 = arith.constant 0 : index
    %87 = vector.load %arg0[%c7_74, %c0_75, %c0_76] : memref<8x2x4xbf16, #tpu.memory_space<vmem>>, vector<1x2x4xbf16>
    %88 = vector.shape_cast %87 : vector<1x2x4xbf16> to vector<2x4xbf16>
    %cst_77 = arith.constant dense<0.000000e+00> : vector<2x256xf32>
    %89 = tpu.matmul %88, %0, %cst_77 {dimension_numbers = #tpu.dot_dimension_numbers<[1], [0], [0], [1], [0, 0, 1, 1], [], []>} : vector<2x4xbf16>, vector<4x256xbf16>, vector<2x256xf32> -> vector<2x256xf32>
    %c0_78 = arith.constant 0 : index
    %c0_79 = arith.constant 0 : index
    %c0_80 = arith.constant 0 : index
    %90 = vector.load %arg0[%c0_78, %c0_79, %c0_80] : memref<8x2x4xbf16, #tpu.memory_space<vmem>>, vector<1x2x4xbf16>
    %91 = vector.shape_cast %90 : vector<1x2x4xbf16> to vector<2x4xbf16>
    %cst_81 = arith.constant dense<0.000000e+00> : vector<2x256xf32>
    %92 = tpu.matmul %91, %1, %cst_81 {dimension_numbers = #tpu.dot_dimension_numbers<[1], [0], [0], [1], [0, 0, 1, 1], [], []>} : vector<2x4xbf16>, vector<4x256xbf16>, vector<2x256xf32> -> vector<2x256xf32>
    %93 = arith.addf %89, %92 : vector<2x256xf32>
    %94 = vector.broadcast %2 : vector<1x256xf32> to vector<2x256xf32>
    %95 = arith.addf %93, %94 : vector<2x256xf32>
    %c7_82 = arith.constant 7 : index
    %c0_83 = arith.constant 0 : index
    %c0_84 = arith.constant 0 : index
    %96 = vector.load %arg9[%c7_82, %c0_83, %c0_84] : memref<8x2x256xf32, #tpu.memory_space<vmem>>, vector<1x2x256xf32>
    %97 = vector.shape_cast %96 : vector<1x2x256xf32> to vector<2x256xf32>
    %98 = vector.shape_cast %95 : vector<2x256xf32> to vector<1x2x256xf32>
    tpu.vector_store %arg9[%c7_82, %c0_83, %c0_84], %98 {strides = array<i32>} : memref<8x2x256xf32, #tpu.memory_space<vmem>>, vector<1x2x256xf32>,
    %c0_85 = arith.constant 0 : index
    %c0_86 = arith.constant 0 : index
    %99 = vector.load %arg4[%c0_85, %c0_86] : memref<64x256xf32, #tpu.memory_space<vmem>>, vector<64x256xf32>
    %100 = tpu.iota {dimensions = array<i32: 1>} : vector<2x256xi32>
    %c192_i32 = arith.constant 192 : i32
    %101 = vector.broadcast %c192_i32 : i32 to vector<2x256xi32>
    %102 = arith.cmpi sge, %100, %101 : vector<2x256xi32>
    %cst_87 = arith.constant 0.000000e+00 : f32
    %103 = vector.broadcast %cst_87 : f32 to vector<2x64xf32>
    %c0_i32 = arith.constant 0 : i32
    %104 = arith.index_cast %c0_i32 : i32 to index
    %c0_88 = arith.constant 0 : index
    %c0_89 = arith.constant 0 : index
    %105 = vector.load %arg9[%104, %c0_88, %c0_89] : memref<8x2x256xf32, #tpu.memory_space<vmem>>, vector<1x2x256xf32>
    %106 = vector.shape_cast %105 : vector<1x2x256xf32> to vector<2x256xf32>
    %cst_90 = arith.constant dense<0.000000e+00> : vector<2x256xf32>
    %107 = tpu.matmul %103, %99, %cst_90 {dimension_numbers = #tpu.dot_dimension_numbers<[1], [0], [0], [1], [0, 0, 1, 1], [], []>} : vector<2x64xf32>, vector<64x256xf32>, vector<2x256xf32> -> vector<2x256xf32>
    %108 = arith.addf %106, %107 : vector<2x256xf32>
    %109 = math.tanh %108 : vector<2x256xf32>
    %110 = arith.negf %108 : vector<2x256xf32>
    %111 = math.exp %110 : vector<2x256xf32>
    %cst_91 = arith.constant 1.000000e+00 : f32
    %112 = vector.broadcast %cst_91 : f32 to vector<2x256xf32>
    %113 = arith.addf %112, %111 : vector<2x256xf32>
    %114 = arith.divf %112, %113 : vector<2x256xf32>
    %115 = arith.select %102, %109, %114 : vector<2x256xi1>, vector<2x256xf32>
    %116 = vector.extract_strided_slice %115 {offsets = [0, 0], sizes = [2, 64], strides = [1, 1]} : vector<2x256xf32> to vector<2x64xf32>
    %117 = vector.extract_strided_slice %115 {offsets = [0, 64], sizes = [2, 64], strides = [1, 1]} : vector<2x256xf32> to vector<2x64xf32>
    %118 = vector.extract_strided_slice %115 {offsets = [0, 128], sizes = [2, 64], strides = [1, 1]} : vector<2x256xf32> to vector<2x64xf32>
    %119 = vector.extract_strided_slice %115 {offsets = [0, 192], sizes = [2, 64], strides = [1, 1]} : vector<2x256xf32> to vector<2x64xf32>
    %120 = arith.mulf %117, %103 : vector<2x64xf32>
    %121 = arith.mulf %116, %119 : vector<2x64xf32>
    %122 = arith.addf %120, %121 : vector<2x64xf32>
    %123 = math.tanh %122 : vector<2x64xf32>
    %124 = arith.mulf %118, %123 : vector<2x64xf32>
    %125 = arith.index_cast %c0_i32 : i32 to index
    %c0_92 = arith.constant 0 : index
    %c0_93 = arith.constant 0 : index
    %126 = vector.load %arg10[%125, %c0_92, %c0_93] : memref<8x2x64xf32, #tpu.memory_space<vmem>>, vector<1x2x64xf32>
    %127 = vector.shape_cast %126 : vector<1x2x64xf32> to vector<2x64xf32>
    %128 = vector.shape_cast %124 : vector<2x64xf32> to vector<1x2x64xf32>
    tpu.vector_store %arg10[%125, %c0_92, %c0_93], %128 {strides = array<i32>} : memref<8x2x64xf32, #tpu.memory_space<vmem>>, vector<1x2x64xf32>,
    %c1_i32 = arith.constant 1 : i32
    %129 = arith.index_cast %c1_i32 : i32 to index
    %c0_94 = arith.constant 0 : index
    %c0_95 = arith.constant 0 : index
    %130 = vector.load %arg9[%129, %c0_94, %c0_95] : memref<8x2x256xf32, #tpu.memory_space<vmem>>, vector<1x2x256xf32>
    %131 = vector.shape_cast %130 : vector<1x2x256xf32> to vector<2x256xf32>
    %cst_96 = arith.constant dense<0.000000e+00> : vector<2x256xf32>
    %132 = tpu.matmul %124, %99, %cst_96 {dimension_numbers = #tpu.dot_dimension_numbers<[1], [0], [0], [1], [0, 0, 1, 1], [], []>} : vector<2x64xf32>, vector<64x256xf32>, vector<2x256xf32> -> vector<2x256xf32>
    %133 = arith.addf %131, %132 : vector<2x256xf32>
    %134 = math.tanh %133 : vector<2x256xf32>
    %135 = arith.negf %133 : vector<2x256xf32>
    %136 = math.exp %135 : vector<2x256xf32>
    %cst_97 = arith.constant 1.000000e+00 : f32
    %137 = vector.broadcast %cst_97 : f32 to vector<2x256xf32>
    %138 = arith.addf %137, %136 : vector<2x256xf32>
    %139 = arith.divf %137, %138 : vector<2x256xf32>
    %140 = arith.select %102, %134, %139 : vector<2x256xi1>, vector<2x256xf32>
    %141 = vector.extract_strided_slice %140 {offsets = [0, 0], sizes = [2, 64], strides = [1, 1]} : vector<2x256xf32> to vector<2x64xf32>
    %142 = vector.extract_strided_slice %140 {offsets = [0, 64], sizes = [2, 64], strides = [1, 1]} : vector<2x256xf32> to vector<2x64xf32>
    %143 = vector.extract_strided_slice %140 {offsets = [0, 128], sizes = [2, 64], strides = [1, 1]} : vector<2x256xf32> to vector<2x64xf32>
    %144 = vector.extract_strided_slice %140 {offsets = [0, 192], sizes = [2, 64], strides = [1, 1]} : vector<2x256xf32> to vector<2x64xf32>
    %145 = arith.mulf %142, %122 : vector<2x64xf32>
    %146 = arith.mulf %141, %144 : vector<2x64xf32>
    %147 = arith.addf %145, %146 : vector<2x64xf32>
    %148 = math.tanh %147 : vector<2x64xf32>
    %149 = arith.mulf %143, %148 : vector<2x64xf32>
    %150 = arith.index_cast %c1_i32 : i32 to index
    %c0_98 = arith.constant 0 : index
    %c0_99 = arith.constant 0 : index
    %151 = vector.load %arg10[%150, %c0_98, %c0_99] : memref<8x2x64xf32, #tpu.memory_space<vmem>>, vector<1x2x64xf32>
    %152 = vector.shape_cast %151 : vector<1x2x64xf32> to vector<2x64xf32>
    %153 = vector.shape_cast %149 : vector<2x64xf32> to vector<1x2x64xf32>
    tpu.vector_store %arg10[%150, %c0_98, %c0_99], %153 {strides = array<i32>} : memref<8x2x64xf32, #tpu.memory_space<vmem>>, vector<1x2x64xf32>,
    %c2_i32 = arith.constant 2 : i32
    %154 = arith.index_cast %c2_i32 : i32 to index
    %c0_100 = arith.constant 0 : index
    %c0_101 = arith.constant 0 : index
    %155 = vector.load %arg9[%154, %c0_100, %c0_101] : memref<8x2x256xf32, #tpu.memory_space<vmem>>, vector<1x2x256xf32>
    %156 = vector.shape_cast %155 : vector<1x2x256xf32> to vector<2x256xf32>
    %cst_102 = arith.constant dense<0.000000e+00> : vector<2x256xf32>
    %157 = tpu.matmul %149, %99, %cst_102 {dimension_numbers = #tpu.dot_dimension_numbers<[1], [0], [0], [1], [0, 0, 1, 1], [], []>} : vector<2x64xf32>, vector<64x256xf32>, vector<2x256xf32> -> vector<2x256xf32>
    %158 = arith.addf %156, %157 : vector<2x256xf32>
    %159 = math.tanh %158 : vector<2x256xf32>
    %160 = arith.negf %158 : vector<2x256xf32>
    %161 = math.exp %160 : vector<2x256xf32>
    %cst_103 = arith.constant 1.000000e+00 : f32
    %162 = vector.broadcast %cst_103 : f32 to vector<2x256xf32>
    %163 = arith.addf %162, %161 : vector<2x256xf32>
    %164 = arith.divf %162, %163 : vector<2x256xf32>
    %165 = arith.select %102, %159, %164 : vector<2x256xi1>, vector<2x256xf32>
    %166 = vector.extract_strided_slice %165 {offsets = [0, 0], sizes = [2, 64], strides = [1, 1]} : vector<2x256xf32> to vector<2x64xf32>
    %167 = vector.extract_strided_slice %165 {offsets = [0, 64], sizes = [2, 64], strides = [1, 1]} : vector<2x256xf32> to vector<2x64xf32>
    %168 = vector.extract_strided_slice %165 {offsets = [0, 128], sizes = [2, 64], strides = [1, 1]} : vector<2x256xf32> to vector<2x64xf32>
    %169 = vector.extract_strided_slice %165 {offsets = [0, 192], sizes = [2, 64], strides = [1, 1]} : vector<2x256xf32> to vector<2x64xf32>
    %170 = arith.mulf %167, %147 : vector<2x64xf32>
    %171 = arith.mulf %166, %169 : vector<2x64xf32>
    %172 = arith.addf %170, %171 : vector<2x64xf32>
    %173 = math.tanh %172 : vector<2x64xf32>
    %174 = arith.mulf %168, %173 : vector<2x64xf32>
    %175 = arith.index_cast %c2_i32 : i32 to index
    %c0_104 = arith.constant 0 : index
    %c0_105 = arith.constant 0 : index
    %176 = vector.load %arg10[%175, %c0_104, %c0_105] : memref<8x2x64xf32, #tpu.memory_space<vmem>>, vector<1x2x64xf32>
    %177 = vector.shape_cast %176 : vector<1x2x64xf32> to vector<2x64xf32>
    %178 = vector.shape_cast %174 : vector<2x64xf32> to vector<1x2x64xf32>
    tpu.vector_store %arg10[%175, %c0_104, %c0_105], %178 {strides = array<i32>} : memref<8x2x64xf32, #tpu.memory_space<vmem>>, vector<1x2x64xf32>,
    %c3_i32 = arith.constant 3 : i32
    %179 = arith.index_cast %c3_i32 : i32 to index
    %c0_106 = arith.constant 0 : index
    %c0_107 = arith.constant 0 : index
    %180 = vector.load %arg9[%179, %c0_106, %c0_107] : memref<8x2x256xf32, #tpu.memory_space<vmem>>, vector<1x2x256xf32>
    %181 = vector.shape_cast %180 : vector<1x2x256xf32> to vector<2x256xf32>
    %cst_108 = arith.constant dense<0.000000e+00> : vector<2x256xf32>
    %182 = tpu.matmul %174, %99, %cst_108 {dimension_numbers = #tpu.dot_dimension_numbers<[1], [0], [0], [1], [0, 0, 1, 1], [], []>} : vector<2x64xf32>, vector<64x256xf32>, vector<2x256xf32> -> vector<2x256xf32>
    %183 = arith.addf %181, %182 : vector<2x256xf32>
    %184 = math.tanh %183 : vector<2x256xf32>
    %185 = arith.negf %183 : vector<2x256xf32>
    %186 = math.exp %185 : vector<2x256xf32>
    %cst_109 = arith.constant 1.000000e+00 : f32
    %187 = vector.broadcast %cst_109 : f32 to vector<2x256xf32>
    %188 = arith.addf %187, %186 : vector<2x256xf32>
    %189 = arith.divf %187, %188 : vector<2x256xf32>
    %190 = arith.select %102, %184, %189 : vector<2x256xi1>, vector<2x256xf32>
    %191 = vector.extract_strided_slice %190 {offsets = [0, 0], sizes = [2, 64], strides = [1, 1]} : vector<2x256xf32> to vector<2x64xf32>
    %192 = vector.extract_strided_slice %190 {offsets = [0, 64], sizes = [2, 64], strides = [1, 1]} : vector<2x256xf32> to vector<2x64xf32>
    %193 = vector.extract_strided_slice %190 {offsets = [0, 128], sizes = [2, 64], strides = [1, 1]} : vector<2x256xf32> to vector<2x64xf32>
    %194 = vector.extract_strided_slice %190 {offsets = [0, 192], sizes = [2, 64], strides = [1, 1]} : vector<2x256xf32> to vector<2x64xf32>
    %195 = arith.mulf %192, %172 : vector<2x64xf32>
    %196 = arith.mulf %191, %194 : vector<2x64xf32>
    %197 = arith.addf %195, %196 : vector<2x64xf32>
    %198 = math.tanh %197 : vector<2x64xf32>
    %199 = arith.mulf %193, %198 : vector<2x64xf32>
    %200 = arith.index_cast %c3_i32 : i32 to index
    %c0_110 = arith.constant 0 : index
    %c0_111 = arith.constant 0 : index
    %201 = vector.load %arg10[%200, %c0_110, %c0_111] : memref<8x2x64xf32, #tpu.memory_space<vmem>>, vector<1x2x64xf32>
    %202 = vector.shape_cast %201 : vector<1x2x64xf32> to vector<2x64xf32>
    %203 = vector.shape_cast %199 : vector<2x64xf32> to vector<1x2x64xf32>
    tpu.vector_store %arg10[%200, %c0_110, %c0_111], %203 {strides = array<i32>} : memref<8x2x64xf32, #tpu.memory_space<vmem>>, vector<1x2x64xf32>,
    %c4_i32 = arith.constant 4 : i32
    %204 = arith.index_cast %c4_i32 : i32 to index
    %c0_112 = arith.constant 0 : index
    %c0_113 = arith.constant 0 : index
    %205 = vector.load %arg9[%204, %c0_112, %c0_113] : memref<8x2x256xf32, #tpu.memory_space<vmem>>, vector<1x2x256xf32>
    %206 = vector.shape_cast %205 : vector<1x2x256xf32> to vector<2x256xf32>
    %cst_114 = arith.constant dense<0.000000e+00> : vector<2x256xf32>
    %207 = tpu.matmul %199, %99, %cst_114 {dimension_numbers = #tpu.dot_dimension_numbers<[1], [0], [0], [1], [0, 0, 1, 1], [], []>} : vector<2x64xf32>, vector<64x256xf32>, vector<2x256xf32> -> vector<2x256xf32>
    %208 = arith.addf %206, %207 : vector<2x256xf32>
    %209 = math.tanh %208 : vector<2x256xf32>
    %210 = arith.negf %208 : vector<2x256xf32>
    %211 = math.exp %210 : vector<2x256xf32>
    %cst_115 = arith.constant 1.000000e+00 : f32
    %212 = vector.broadcast %cst_115 : f32 to vector<2x256xf32>
    %213 = arith.addf %212, %211 : vector<2x256xf32>
    %214 = arith.divf %212, %213 : vector<2x256xf32>
    %215 = arith.select %102, %209, %214 : vector<2x256xi1>, vector<2x256xf32>
    %216 = vector.extract_strided_slice %215 {offsets = [0, 0], sizes = [2, 64], strides = [1, 1]} : vector<2x256xf32> to vector<2x64xf32>
    %217 = vector.extract_strided_slice %215 {offsets = [0, 64], sizes = [2, 64], strides = [1, 1]} : vector<2x256xf32> to vector<2x64xf32>
    %218 = vector.extract_strided_slice %215 {offsets = [0, 128], sizes = [2, 64], strides = [1, 1]} : vector<2x256xf32> to vector<2x64xf32>
    %219 = vector.extract_strided_slice %215 {offsets = [0, 192], sizes = [2, 64], strides = [1, 1]} : vector<2x256xf32> to vector<2x64xf32>
    %220 = arith.mulf %217, %197 : vector<2x64xf32>
    %221 = arith.mulf %216, %219 : vector<2x64xf32>
    %222 = arith.addf %220, %221 : vector<2x64xf32>
    %223 = math.tanh %222 : vector<2x64xf32>
    %224 = arith.mulf %218, %223 : vector<2x64xf32>
    %225 = arith.index_cast %c4_i32 : i32 to index
    %c0_116 = arith.constant 0 : index
    %c0_117 = arith.constant 0 : index
    %226 = vector.load %arg10[%225, %c0_116, %c0_117] : memref<8x2x64xf32, #tpu.memory_space<vmem>>, vector<1x2x64xf32>
    %227 = vector.shape_cast %226 : vector<1x2x64xf32> to vector<2x64xf32>
    %228 = vector.shape_cast %224 : vector<2x64xf32> to vector<1x2x64xf32>
    tpu.vector_store %arg10[%225, %c0_116, %c0_117], %228 {strides = array<i32>} : memref<8x2x64xf32, #tpu.memory_space<vmem>>, vector<1x2x64xf32>,
    %c5_i32 = arith.constant 5 : i32
    %229 = arith.index_cast %c5_i32 : i32 to index
    %c0_118 = arith.constant 0 : index
    %c0_119 = arith.constant 0 : index
    %230 = vector.load %arg9[%229, %c0_118, %c0_119] : memref<8x2x256xf32, #tpu.memory_space<vmem>>, vector<1x2x256xf32>
    %231 = vector.shape_cast %230 : vector<1x2x256xf32> to vector<2x256xf32>
    %cst_120 = arith.constant dense<0.000000e+00> : vector<2x256xf32>
    %232 = tpu.matmul %224, %99, %cst_120 {dimension_numbers = #tpu.dot_dimension_numbers<[1], [0], [0], [1], [0, 0, 1, 1], [], []>} : vector<2x64xf32>, vector<64x256xf32>, vector<2x256xf32> -> vector<2x256xf32>
    %233 = arith.addf %231, %232 : vector<2x256xf32>
    %234 = math.tanh %233 : vector<2x256xf32>
    %235 = arith.negf %233 : vector<2x256xf32>
    %236 = math.exp %235 : vector<2x256xf32>
    %cst_121 = arith.constant 1.000000e+00 : f32
    %237 = vector.broadcast %cst_121 : f32 to vector<2x256xf32>
    %238 = arith.addf %237, %236 : vector<2x256xf32>
    %239 = arith.divf %237, %238 : vector<2x256xf32>
    %240 = arith.select %102, %234, %239 : vector<2x256xi1>, vector<2x256xf32>
    %241 = vector.extract_strided_slice %240 {offsets = [0, 0], sizes = [2, 64], strides = [1, 1]} : vector<2x256xf32> to vector<2x64xf32>
    %242 = vector.extract_strided_slice %240 {offsets = [0, 64], sizes = [2, 64], strides = [1, 1]} : vector<2x256xf32> to vector<2x64xf32>
    %243 = vector.extract_strided_slice %240 {offsets = [0, 128], sizes = [2, 64], strides = [1, 1]} : vector<2x256xf32> to vector<2x64xf32>
    %244 = vector.extract_strided_slice %240 {offsets = [0, 192], sizes = [2, 64], strides = [1, 1]} : vector<2x256xf32> to vector<2x64xf32>
    %245 = arith.mulf %242, %222 : vector<2x64xf32>
    %246 = arith.mulf %241, %244 : vector<2x64xf32>
    %247 = arith.addf %245, %246 : vector<2x64xf32>
    %248 = math.tanh %247 : vector<2x64xf32>
    %249 = arith.mulf %243, %248 : vector<2x64xf32>
    %250 = arith.index_cast %c5_i32 : i32 to index
    %c0_122 = arith.constant 0 : index
    %c0_123 = arith.constant 0 : index
    %251 = vector.load %arg10[%250, %c0_122, %c0_123] : memref<8x2x64xf32, #tpu.memory_space<vmem>>, vector<1x2x64xf32>
    %252 = vector.shape_cast %251 : vector<1x2x64xf32> to vector<2x64xf32>
    %253 = vector.shape_cast %249 : vector<2x64xf32> to vector<1x2x64xf32>
    tpu.vector_store %arg10[%250, %c0_122, %c0_123], %253 {strides = array<i32>} : memref<8x2x64xf32, #tpu.memory_space<vmem>>, vector<1x2x64xf32>,
    %c6_i32 = arith.constant 6 : i32
    %254 = arith.index_cast %c6_i32 : i32 to index
    %c0_124 = arith.constant 0 : index
    %c0_125 = arith.constant 0 : index
    %255 = vector.load %arg9[%254, %c0_124, %c0_125] : memref<8x2x256xf32, #tpu.memory_space<vmem>>, vector<1x2x256xf32>
    %256 = vector.shape_cast %255 : vector<1x2x256xf32> to vector<2x256xf32>
    %cst_126 = arith.constant dense<0.000000e+00> : vector<2x256xf32>
    %257 = tpu.matmul %249, %99, %cst_126 {dimension_numbers = #tpu.dot_dimension_numbers<[1], [0], [0], [1], [0, 0, 1, 1], [], []>} : vector<2x64xf32>, vector<64x256xf32>, vector<2x256xf32> -> vector<2x256xf32>
    %258 = arith.addf %256, %257 : vector<2x256xf32>
    %259 = math.tanh %258 : vector<2x256xf32>
    %260 = arith.negf %258 : vector<2x256xf32>
    %261 = math.exp %260 : vector<2x256xf32>
    %cst_127 = arith.constant 1.000000e+00 : f32
    %262 = vector.broadcast %cst_127 : f32 to vector<2x256xf32>
    %263 = arith.addf %262, %261 : vector<2x256xf32>
    %264 = arith.divf %262, %263 : vector<2x256xf32>
    %265 = arith.select %102, %259, %264 : vector<2x256xi1>, vector<2x256xf32>
    %266 = vector.extract_strided_slice %265 {offsets = [0, 0], sizes = [2, 64], strides = [1, 1]} : vector<2x256xf32> to vector<2x64xf32>
    %267 = vector.extract_strided_slice %265 {offsets = [0, 64], sizes = [2, 64], strides = [1, 1]} : vector<2x256xf32> to vector<2x64xf32>
    %268 = vector.extract_strided_slice %265 {offsets = [0, 128], sizes = [2, 64], strides = [1, 1]} : vector<2x256xf32> to vector<2x64xf32>
    %269 = vector.extract_strided_slice %265 {offsets = [0, 192], sizes = [2, 64], strides = [1, 1]} : vector<2x256xf32> to vector<2x64xf32>
    %270 = arith.mulf %267, %247 : vector<2x64xf32>
    %271 = arith.mulf %266, %269 : vector<2x64xf32>
    %272 = arith.addf %270, %271 : vector<2x64xf32>
    %273 = math.tanh %272 : vector<2x64xf32>
    %274 = arith.mulf %268, %273 : vector<2x64xf32>
    %275 = arith.index_cast %c6_i32 : i32 to index
    %c0_128 = arith.constant 0 : index
    %c0_129 = arith.constant 0 : index
    %276 = vector.load %arg10[%275, %c0_128, %c0_129] : memref<8x2x64xf32, #tpu.memory_space<vmem>>, vector<1x2x64xf32>
    %277 = vector.shape_cast %276 : vector<1x2x64xf32> to vector<2x64xf32>
    %278 = vector.shape_cast %274 : vector<2x64xf32> to vector<1x2x64xf32>
    tpu.vector_store %arg10[%275, %c0_128, %c0_129], %278 {strides = array<i32>} : memref<8x2x64xf32, #tpu.memory_space<vmem>>, vector<1x2x64xf32>,
    %c7_i32 = arith.constant 7 : i32
    %279 = arith.index_cast %c7_i32 : i32 to index
    %c0_130 = arith.constant 0 : index
    %c0_131 = arith.constant 0 : index
    %280 = vector.load %arg9[%279, %c0_130, %c0_131] : memref<8x2x256xf32, #tpu.memory_space<vmem>>, vector<1x2x256xf32>
    %281 = vector.shape_cast %280 : vector<1x2x256xf32> to vector<2x256xf32>
    %cst_132 = arith.constant dense<0.000000e+00> : vector<2x256xf32>
    %282 = tpu.matmul %274, %99, %cst_132 {dimension_numbers = #tpu.dot_dimension_numbers<[1], [0], [0], [1], [0, 0, 1, 1], [], []>} : vector<2x64xf32>, vector<64x256xf32>, vector<2x256xf32> -> vector<2x256xf32>
    %283 = arith.addf %281, %282 : vector<2x256xf32>
    %284 = math.tanh %283 : vector<2x256xf32>
    %285 = arith.negf %283 : vector<2x256xf32>
    %286 = math.exp %285 : vector<2x256xf32>
    %cst_133 = arith.constant 1.000000e+00 : f32
    %287 = vector.broadcast %cst_133 : f32 to vector<2x256xf32>
    %288 = arith.addf %287, %286 : vector<2x256xf32>
    %289 = arith.divf %287, %288 : vector<2x256xf32>
    %290 = arith.select %102, %284, %289 : vector<2x256xi1>, vector<2x256xf32>
    %291 = vector.extract_strided_slice %290 {offsets = [0, 0], sizes = [2, 64], strides = [1, 1]} : vector<2x256xf32> to vector<2x64xf32>
    %292 = vector.extract_strided_slice %290 {offsets = [0, 64], sizes = [2, 64], strides = [1, 1]} : vector<2x256xf32> to vector<2x64xf32>
    %293 = vector.extract_strided_slice %290 {offsets = [0, 128], sizes = [2, 64], strides = [1, 1]} : vector<2x256xf32> to vector<2x64xf32>
    %294 = vector.extract_strided_slice %290 {offsets = [0, 192], sizes = [2, 64], strides = [1, 1]} : vector<2x256xf32> to vector<2x64xf32>
    %295 = arith.mulf %292, %272 : vector<2x64xf32>
    %296 = arith.mulf %291, %294 : vector<2x64xf32>
    %297 = arith.addf %295, %296 : vector<2x64xf32>
    %298 = math.tanh %297 : vector<2x64xf32>
    %299 = arith.mulf %293, %298 : vector<2x64xf32>
    %300 = arith.index_cast %c7_i32 : i32 to index
    %c0_134 = arith.constant 0 : index
    %c0_135 = arith.constant 0 : index
    %301 = vector.load %arg10[%300, %c0_134, %c0_135] : memref<8x2x64xf32, #tpu.memory_space<vmem>>, vector<1x2x64xf32>
    %302 = vector.shape_cast %301 : vector<1x2x64xf32> to vector<2x64xf32>
    %303 = vector.shape_cast %299 : vector<2x64xf32> to vector<1x2x64xf32>
    tpu.vector_store %arg10[%300, %c0_134, %c0_135], %303 {strides = array<i32>} : memref<8x2x64xf32, #tpu.memory_space<vmem>>, vector<1x2x64xf32>,
    %c8_i32 = arith.constant 8 : i32
    %c0_136 = arith.constant 0 : index
    %c0_137 = arith.constant 0 : index
    %304 = vector.load %arg5[%c0_136, %c0_137] : memref<64x128xbf16, #tpu.memory_space<vmem>>, vector<64x128xbf16>
    %c0_138 = arith.constant 0 : index
    %c0_139 = arith.constant 0 : index
    %305 = vector.load %arg6[%c0_138, %c0_139] : memref<64x128xbf16, #tpu.memory_space<vmem>>, vector<64x128xbf16>
    %c0_140 = arith.constant 0 : index
    %c0_141 = arith.constant 0 : index
    %306 = vector.load %arg7[%c0_140, %c0_141] : memref<1x128xf32, #tpu.memory_space<vmem>>, vector<1x128xf32>
    %c0_142 = arith.constant 0 : index
    %c0_143 = arith.constant 0 : index
    %c0_144 = arith.constant 0 : index
    %307 = vector.load %arg10[%c0_142, %c0_143, %c0_144] : memref<8x2x64xf32, #tpu.memory_space<vmem>>, vector<1x2x64xf32>
    %308 = vector.shape_cast %307 : vector<1x2x64xf32> to vector<2x64xf32>
    %309 = arith.truncf %308 : vector<2x64xf32> to vector<2x64xbf16>
    %c7_145 = arith.constant 7 : index
    %c0_146 = arith.constant 0 : index
    %c0_147 = arith.constant 0 : index
    %310 = vector.load %arg10[%c7_145, %c0_146, %c0_147] : memref<8x2x64xf32, #tpu.memory_space<vmem>>, vector<1x2x64xf32>
    %311 = vector.shape_cast %310 : vector<1x2x64xf32> to vector<2x64xf32>
    %312 = arith.truncf %311 : vector<2x64xf32> to vector<2x64xbf16>
    %cst_148 = arith.constant dense<0.000000e+00> : vector<2x128xf32>
    %313 = tpu.matmul %309, %304, %cst_148 {dimension_numbers = #tpu.dot_dimension_numbers<[1], [0], [0], [1], [0, 0, 1, 1], [], []>} : vector<2x64xbf16>, vector<64x128xbf16>, vector<2x128xf32> -> vector<2x128xf32>
    %cst_149 = arith.constant dense<0.000000e+00> : vector<2x128xf32>
    %314 = tpu.matmul %312, %305, %cst_149 {dimension_numbers = #tpu.dot_dimension_numbers<[1], [0], [0], [1], [0, 0, 1, 1], [], []>} : vector<2x64xbf16>, vector<64x128xbf16>, vector<2x128xf32> -> vector<2x128xf32>
    %315 = arith.addf %313, %314 : vector<2x128xf32>
    %316 = vector.broadcast %306 : vector<1x128xf32> to vector<2x128xf32>
    %317 = arith.addf %315, %316 : vector<2x128xf32>
    %318 = math.tanh %317 : vector<2x128xf32>
    %c0_150 = arith.constant 0 : index
    %c0_151 = arith.constant 0 : index
    %c0_152 = arith.constant 0 : index
    %319 = vector.load %arg8[%c0_150, %c0_151, %c0_152] : memref<8x2x128xf32, #tpu.memory_space<vmem>>, vector<1x2x128xf32>
    %320 = vector.shape_cast %319 : vector<1x2x128xf32> to vector<2x128xf32>
    %321 = vector.shape_cast %318 : vector<2x128xf32> to vector<1x2x128xf32>
    tpu.vector_store %arg8[%c0_150, %c0_151, %c0_152], %321 {strides = array<i32>} : memref<8x2x128xf32, #tpu.memory_space<vmem>>, vector<1x2x128xf32>,
    %c1_153 = arith.constant 1 : index
    %c0_154 = arith.constant 0 : index
    %c0_155 = arith.constant 0 : index
    %322 = vector.load %arg10[%c1_153, %c0_154, %c0_155] : memref<8x2x64xf32, #tpu.memory_space<vmem>>, vector<1x2x64xf32>
    %323 = vector.shape_cast %322 : vector<1x2x64xf32> to vector<2x64xf32>
    %324 = arith.truncf %323 : vector<2x64xf32> to vector<2x64xbf16>
    %c6_156 = arith.constant 6 : index
    %c0_157 = arith.constant 0 : index
    %c0_158 = arith.constant 0 : index
    %325 = vector.load %arg10[%c6_156, %c0_157, %c0_158] : memref<8x2x64xf32, #tpu.memory_space<vmem>>, vector<1x2x64xf32>
    %326 = vector.shape_cast %325 : vector<1x2x64xf32> to vector<2x64xf32>
    %327 = arith.truncf %326 : vector<2x64xf32> to vector<2x64xbf16>
    %cst_159 = arith.constant dense<0.000000e+00> : vector<2x128xf32>
    %328 = tpu.matmul %324, %304, %cst_159 {dimension_numbers = #tpu.dot_dimension_numbers<[1], [0], [0], [1], [0, 0, 1, 1], [], []>} : vector<2x64xbf16>, vector<64x128xbf16>, vector<2x128xf32> -> vector<2x128xf32>
    %cst_160 = arith.constant dense<0.000000e+00> : vector<2x128xf32>
    %329 = tpu.matmul %327, %305, %cst_160 {dimension_numbers = #tpu.dot_dimension_numbers<[1], [0], [0], [1], [0, 0, 1, 1], [], []>} : vector<2x64xbf16>, vector<64x128xbf16>, vector<2x128xf32> -> vector<2x128xf32>
    %330 = arith.addf %328, %329 : vector<2x128xf32>
    %331 = vector.broadcast %306 : vector<1x128xf32> to vector<2x128xf32>
    %332 = arith.addf %330, %331 : vector<2x128xf32>
    %333 = math.tanh %332 : vector<2x128xf32>
    %c1_161 = arith.constant 1 : index
    %c0_162 = arith.constant 0 : index
    %c0_163 = arith.constant 0 : index
    %334 = vector.load %arg8[%c1_161, %c0_162, %c0_163] : memref<8x2x128xf32, #tpu.memory_space<vmem>>, vector<1x2x128xf32>
    %335 = vector.shape_cast %334 : vector<1x2x128xf32> to vector<2x128xf32>
    %336 = vector.shape_cast %333 : vector<2x128xf32> to vector<1x2x128xf32>
    tpu.vector_store %arg8[%c1_161, %c0_162, %c0_163], %336 {strides = array<i32>} : memref<8x2x128xf32, #tpu.memory_space<vmem>>, vector<1x2x128xf32>,
    %c2_164 = arith.constant 2 : index
    %c0_165 = arith.constant 0 : index
    %c0_166 = arith.constant 0 : index
    %337 = vector.load %arg10[%c2_164, %c0_165, %c0_166] : memref<8x2x64xf32, #tpu.memory_space<vmem>>, vector<1x2x64xf32>
    %338 = vector.shape_cast %337 : vector<1x2x64xf32> to vector<2x64xf32>
    %339 = arith.truncf %338 : vector<2x64xf32> to vector<2x64xbf16>
    %c5_167 = arith.constant 5 : index
    %c0_168 = arith.constant 0 : index
    %c0_169 = arith.constant 0 : index
    %340 = vector.load %arg10[%c5_167, %c0_168, %c0_169] : memref<8x2x64xf32, #tpu.memory_space<vmem>>, vector<1x2x64xf32>
    %341 = vector.shape_cast %340 : vector<1x2x64xf32> to vector<2x64xf32>
    %342 = arith.truncf %341 : vector<2x64xf32> to vector<2x64xbf16>
    %cst_170 = arith.constant dense<0.000000e+00> : vector<2x128xf32>
    %343 = tpu.matmul %339, %304, %cst_170 {dimension_numbers = #tpu.dot_dimension_numbers<[1], [0], [0], [1], [0, 0, 1, 1], [], []>} : vector<2x64xbf16>, vector<64x128xbf16>, vector<2x128xf32> -> vector<2x128xf32>
    %cst_171 = arith.constant dense<0.000000e+00> : vector<2x128xf32>
    %344 = tpu.matmul %342, %305, %cst_171 {dimension_numbers = #tpu.dot_dimension_numbers<[1], [0], [0], [1], [0, 0, 1, 1], [], []>} : vector<2x64xbf16>, vector<64x128xbf16>, vector<2x128xf32> -> vector<2x128xf32>
    %345 = arith.addf %343, %344 : vector<2x128xf32>
    %346 = vector.broadcast %306 : vector<1x128xf32> to vector<2x128xf32>
    %347 = arith.addf %345, %346 : vector<2x128xf32>
    %348 = math.tanh %347 : vector<2x128xf32>
    %c2_172 = arith.constant 2 : index
    %c0_173 = arith.constant 0 : index
    %c0_174 = arith.constant 0 : index
    %349 = vector.load %arg8[%c2_172, %c0_173, %c0_174] : memref<8x2x128xf32, #tpu.memory_space<vmem>>, vector<1x2x128xf32>
    %350 = vector.shape_cast %349 : vector<1x2x128xf32> to vector<2x128xf32>
    %351 = vector.shape_cast %348 : vector<2x128xf32> to vector<1x2x128xf32>
    tpu.vector_store %arg8[%c2_172, %c0_173, %c0_174], %351 {strides = array<i32>} : memref<8x2x128xf32, #tpu.memory_space<vmem>>, vector<1x2x128xf32>,
    %c3_175 = arith.constant 3 : index
    %c0_176 = arith.constant 0 : index
    %c0_177 = arith.constant 0 : index
    %352 = vector.load %arg10[%c3_175, %c0_176, %c0_177] : memref<8x2x64xf32, #tpu.memory_space<vmem>>, vector<1x2x64xf32>
    %353 = vector.shape_cast %352 : vector<1x2x64xf32> to vector<2x64xf32>
    %354 = arith.truncf %353 : vector<2x64xf32> to vector<2x64xbf16>
    %c4_178 = arith.constant 4 : index
    %c0_179 = arith.constant 0 : index
    %c0_180 = arith.constant 0 : index
    %355 = vector.load %arg10[%c4_178, %c0_179, %c0_180] : memref<8x2x64xf32, #tpu.memory_space<vmem>>, vector<1x2x64xf32>
    %356 = vector.shape_cast %355 : vector<1x2x64xf32> to vector<2x64xf32>
    %357 = arith.truncf %356 : vector<2x64xf32> to vector<2x64xbf16>
    %cst_181 = arith.constant dense<0.000000e+00> : vector<2x128xf32>
    %358 = tpu.matmul %354, %304, %cst_181 {dimension_numbers = #tpu.dot_dimension_numbers<[1], [0], [0], [1], [0, 0, 1, 1], [], []>} : vector<2x64xbf16>, vector<64x128xbf16>, vector<2x128xf32> -> vector<2x128xf32>
    %cst_182 = arith.constant dense<0.000000e+00> : vector<2x128xf32>
    %359 = tpu.matmul %357, %305, %cst_182 {dimension_numbers = #tpu.dot_dimension_numbers<[1], [0], [0], [1], [0, 0, 1, 1], [], []>} : vector<2x64xbf16>, vector<64x128xbf16>, vector<2x128xf32> -> vector<2x128xf32>
    %360 = arith.addf %358, %359 : vector<2x128xf32>
    %361 = vector.broadcast %306 : vector<1x128xf32> to vector<2x128xf32>
    %362 = arith.addf %360, %361 : vector<2x128xf32>
    %363 = math.tanh %362 : vector<2x128xf32>
    %c3_183 = arith.constant 3 : index
    %c0_184 = arith.constant 0 : index
    %c0_185 = arith.constant 0 : index
    %364 = vector.load %arg8[%c3_183, %c0_184, %c0_185] : memref<8x2x128xf32, #tpu.memory_space<vmem>>, vector<1x2x128xf32>
    %365 = vector.shape_cast %364 : vector<1x2x128xf32> to vector<2x128xf32>
    %366 = vector.shape_cast %363 : vector<2x128xf32> to vector<1x2x128xf32>
    tpu.vector_store %arg8[%c3_183, %c0_184, %c0_185], %366 {strides = array<i32>} : memref<8x2x128xf32, #tpu.memory_space<vmem>>, vector<1x2x128xf32>,
    %c4_186 = arith.constant 4 : index
    %c0_187 = arith.constant 0 : index
    %c0_188 = arith.constant 0 : index
    %367 = vector.load %arg10[%c4_186, %c0_187, %c0_188] : memref<8x2x64xf32, #tpu.memory_space<vmem>>, vector<1x2x64xf32>
    %368 = vector.shape_cast %367 : vector<1x2x64xf32> to vector<2x64xf32>
    %369 = arith.truncf %368 : vector<2x64xf32> to vector<2x64xbf16>
    %c3_189 = arith.constant 3 : index
    %c0_190 = arith.constant 0 : index
    %c0_191 = arith.constant 0 : index
    %370 = vector.load %arg10[%c3_189, %c0_190, %c0_191] : memref<8x2x64xf32, #tpu.memory_space<vmem>>, vector<1x2x64xf32>
    %371 = vector.shape_cast %370 : vector<1x2x64xf32> to vector<2x64xf32>
    %372 = arith.truncf %371 : vector<2x64xf32> to vector<2x64xbf16>
    %cst_192 = arith.constant dense<0.000000e+00> : vector<2x128xf32>
    %373 = tpu.matmul %369, %304, %cst_192 {dimension_numbers = #tpu.dot_dimension_numbers<[1], [0], [0], [1], [0, 0, 1, 1], [], []>} : vector<2x64xbf16>, vector<64x128xbf16>, vector<2x128xf32> -> vector<2x128xf32>
    %cst_193 = arith.constant dense<0.000000e+00> : vector<2x128xf32>
    %374 = tpu.matmul %372, %305, %cst_193 {dimension_numbers = #tpu.dot_dimension_numbers<[1], [0], [0], [1], [0, 0, 1, 1], [], []>} : vector<2x64xbf16>, vector<64x128xbf16>, vector<2x128xf32> -> vector<2x128xf32>
    %375 = arith.addf %373, %374 : vector<2x128xf32>
    %376 = vector.broadcast %306 : vector<1x128xf32> to vector<2x128xf32>
    %377 = arith.addf %375, %376 : vector<2x128xf32>
    %378 = math.tanh %377 : vector<2x128xf32>
    %c4_194 = arith.constant 4 : index
    %c0_195 = arith.constant 0 : index
    %c0_196 = arith.constant 0 : index
    %379 = vector.load %arg8[%c4_194, %c0_195, %c0_196] : memref<8x2x128xf32, #tpu.memory_space<vmem>>, vector<1x2x128xf32>
    %380 = vector.shape_cast %379 : vector<1x2x128xf32> to vector<2x128xf32>
    %381 = vector.shape_cast %378 : vector<2x128xf32> to vector<1x2x128xf32>
    tpu.vector_store %arg8[%c4_194, %c0_195, %c0_196], %381 {strides = array<i32>} : memref<8x2x128xf32, #tpu.memory_space<vmem>>, vector<1x2x128xf32>,
    %c5_197 = arith.constant 5 : index
    %c0_198 = arith.constant 0 : index
    %c0_199 = arith.constant 0 : index
    %382 = vector.load %arg10[%c5_197, %c0_198, %c0_199] : memref<8x2x64xf32, #tpu.memory_space<vmem>>, vector<1x2x64xf32>
    %383 = vector.shape_cast %382 : vector<1x2x64xf32> to vector<2x64xf32>
    %384 = arith.truncf %383 : vector<2x64xf32> to vector<2x64xbf16>
    %c2_200 = arith.constant 2 : index
    %c0_201 = arith.constant 0 : index
    %c0_202 = arith.constant 0 : index
    %385 = vector.load %arg10[%c2_200, %c0_201, %c0_202] : memref<8x2x64xf32, #tpu.memory_space<vmem>>, vector<1x2x64xf32>
    %386 = vector.shape_cast %385 : vector<1x2x64xf32> to vector<2x64xf32>
    %387 = arith.truncf %386 : vector<2x64xf32> to vector<2x64xbf16>
    %cst_203 = arith.constant dense<0.000000e+00> : vector<2x128xf32>
    %388 = tpu.matmul %384, %304, %cst_203 {dimension_numbers = #tpu.dot_dimension_numbers<[1], [0], [0], [1], [0, 0, 1, 1], [], []>} : vector<2x64xbf16>, vector<64x128xbf16>, vector<2x128xf32> -> vector<2x128xf32>
    %cst_204 = arith.constant dense<0.000000e+00> : vector<2x128xf32>
    %389 = tpu.matmul %387, %305, %cst_204 {dimension_numbers = #tpu.dot_dimension_numbers<[1], [0], [0], [1], [0, 0, 1, 1], [], []>} : vector<2x64xbf16>, vector<64x128xbf16>, vector<2x128xf32> -> vector<2x128xf32>
    %390 = arith.addf %388, %389 : vector<2x128xf32>
    %391 = vector.broadcast %306 : vector<1x128xf32> to vector<2x128xf32>
    %392 = arith.addf %390, %391 : vector<2x128xf32>
    %393 = math.tanh %392 : vector<2x128xf32>
    %c5_205 = arith.constant 5 : index
    %c0_206 = arith.constant 0 : index
    %c0_207 = arith.constant 0 : index
    %394 = vector.load %arg8[%c5_205, %c0_206, %c0_207] : memref<8x2x128xf32, #tpu.memory_space<vmem>>, vector<1x2x128xf32>
    %395 = vector.shape_cast %394 : vector<1x2x128xf32> to vector<2x128xf32>
    %396 = vector.shape_cast %393 : vector<2x128xf32> to vector<1x2x128xf32>
    tpu.vector_store %arg8[%c5_205, %c0_206, %c0_207], %396 {strides = array<i32>} : memref<8x2x128xf32, #tpu.memory_space<vmem>>, vector<1x2x128xf32>,
    %c6_208 = arith.constant 6 : index
    %c0_209 = arith.constant 0 : index
    %c0_210 = arith.constant 0 : index
    %397 = vector.load %arg10[%c6_208, %c0_209, %c0_210] : memref<8x2x64xf32, #tpu.memory_space<vmem>>, vector<1x2x64xf32>
    %398 = vector.shape_cast %397 : vector<1x2x64xf32> to vector<2x64xf32>
    %399 = arith.truncf %398 : vector<2x64xf32> to vector<2x64xbf16>
    %c1_211 = arith.constant 1 : index
    %c0_212 = arith.constant 0 : index
    %c0_213 = arith.constant 0 : index
    %400 = vector.load %arg10[%c1_211, %c0_212, %c0_213] : memref<8x2x64xf32, #tpu.memory_space<vmem>>, vector<1x2x64xf32>
    %401 = vector.shape_cast %400 : vector<1x2x64xf32> to vector<2x64xf32>
    %402 = arith.truncf %401 : vector<2x64xf32> to vector<2x64xbf16>
    %cst_214 = arith.constant dense<0.000000e+00> : vector<2x128xf32>
    %403 = tpu.matmul %399, %304, %cst_214 {dimension_numbers = #tpu.dot_dimension_numbers<[1], [0], [0], [1], [0, 0, 1, 1], [], []>} : vector<2x64xbf16>, vector<64x128xbf16>, vector<2x128xf32> -> vector<2x128xf32>
    %cst_215 = arith.constant dense<0.000000e+00> : vector<2x128xf32>
    %404 = tpu.matmul %402, %305, %cst_215 {dimension_numbers = #tpu.dot_dimension_numbers<[1], [0], [0], [1], [0, 0, 1, 1], [], []>} : vector<2x64xbf16>, vector<64x128xbf16>, vector<2x128xf32> -> vector<2x128xf32>
    %405 = arith.addf %403, %404 : vector<2x128xf32>
    %406 = vector.broadcast %306 : vector<1x128xf32> to vector<2x128xf32>
    %407 = arith.addf %405, %406 : vector<2x128xf32>
    %408 = math.tanh %407 : vector<2x128xf32>
    %c6_216 = arith.constant 6 : index
    %c0_217 = arith.constant 0 : index
    %c0_218 = arith.constant 0 : index
    %409 = vector.load %arg8[%c6_216, %c0_217, %c0_218] : memref<8x2x128xf32, #tpu.memory_space<vmem>>, vector<1x2x128xf32>
    %410 = vector.shape_cast %409 : vector<1x2x128xf32> to vector<2x128xf32>
    %411 = vector.shape_cast %408 : vector<2x128xf32> to vector<1x2x128xf32>
    tpu.vector_store %arg8[%c6_216, %c0_217, %c0_218], %411 {strides = array<i32>} : memref<8x2x128xf32, #tpu.memory_space<vmem>>, vector<1x2x128xf32>,
    %c7_219 = arith.constant 7 : index
    %c0_220 = arith.constant 0 : index
    %c0_221 = arith.constant 0 : index
    %412 = vector.load %arg10[%c7_219, %c0_220, %c0_221] : memref<8x2x64xf32, #tpu.memory_space<vmem>>, vector<1x2x64xf32>
    %413 = vector.shape_cast %412 : vector<1x2x64xf32> to vector<2x64xf32>
    %414 = arith.truncf %413 : vector<2x64xf32> to vector<2x64xbf16>
    %c0_222 = arith.constant 0 : index
    %c0_223 = arith.constant 0 : index
    %c0_224 = arith.constant 0 : index
    %415 = vector.load %arg10[%c0_222, %c0_223, %c0_224] : memref<8x2x64xf32, #tpu.memory_space<vmem>>, vector<1x2x64xf32>
    %416 = vector.shape_cast %415 : vector<1x2x64xf32> to vector<2x64xf32>
    %417 = arith.truncf %416 : vector<2x64xf32> to vector<2x64xbf16>
    %cst_225 = arith.constant dense<0.000000e+00> : vector<2x128xf32>
    %418 = tpu.matmul %414, %304, %cst_225 {dimension_numbers = #tpu.dot_dimension_numbers<[1], [0], [0], [1], [0, 0, 1, 1], [], []>} : vector<2x64xbf16>, vector<64x128xbf16>, vector<2x128xf32> -> vector<2x128xf32>
    %cst_226 = arith.constant dense<0.000000e+00> : vector<2x128xf32>
    %419 = tpu.matmul %417, %305, %cst_226 {dimension_numbers = #tpu.dot_dimension_numbers<[1], [0], [0], [1], [0, 0, 1, 1], [], []>} : vector<2x64xbf16>, vector<64x128xbf16>, vector<2x128xf32> -> vector<2x128xf32>
    %420 = arith.addf %418, %419 : vector<2x128xf32>
    %421 = vector.broadcast %306 : vector<1x128xf32> to vector<2x128xf32>
    %422 = arith.addf %420, %421 : vector<2x128xf32>
    %423 = math.tanh %422 : vector<2x128xf32>
    %c7_227 = arith.constant 7 : index
    %c0_228 = arith.constant 0 : index
    %c0_229 = arith.constant 0 : index
    %424 = vector.load %arg8[%c7_227, %c0_228, %c0_229] : memref<8x2x128xf32, #tpu.memory_space<vmem>>, vector<1x2x128xf32>
    %425 = vector.shape_cast %424 : vector<1x2x128xf32> to vector<2x128xf32>
    %426 = vector.shape_cast %423 : vector<2x128xf32> to vector<1x2x128xf32>
    tpu.vector_store %arg8[%c7_227, %c0_228, %c0_229], %426 {strides = array<i32>} : memref<8x2x128xf32, #tpu.memory_space<vmem>>, vector<1x2x128xf32>,
    return
  }
}

</mosaic_0001>

<bundles_post_ra>
// kernel: generator_rnn_forward.1
= control target key start
LH: loop header
LB: loop body
LE: loop exit
PB: predicated region body
PF: predicated region fallthrough
CT: control target
= control target key end

     0   :  { %13 = vsyncpa [#allocation5], 0  ;;  %s2919_s0 = inlined_call_operand.vmem [shape: bf16[8,2,4], index: 0, kind: input, shape index: {}]   ;;  %s2920_s1 = inlined_call_operand.vmem [shape: bf16[4,256], index: 1, kind: input, shape index: {}]   ;;  %s2921_s2 = inlined_call_operand.vmem [shape: bf16[4,256], index: 2, kind: input, shape index: {}]   ;;  %s2922_s3 = inlined_call_operand.vmem [shape: f32[1,256], index: 3, kind: input, shape index: {}]   ;;  %s2923_s4 = inlined_call_operand.hbm [shape: f32[64,256], index: 4, kind: input, shape index: {}]   ;;  %s2924_s5 = inlined_call_operand.hbm [shape: bf16[64,128], index: 5, kind: input, shape index: {}]   ;;  %s2925_s6 = inlined_call_operand.hbm [shape: bf16[64,128], index: 6, kind: input, shape index: {}]   ;;  %s2926_s7 = inlined_call_operand.vmem [shape: f32[1,128], index: 7, kind: input, shape index: {}]   ;;  %s2927_s8 = inlined_call_operand.vmem [shape: f32[8,2,128], index: 8, kind: output, shape index: {}]  }
   0x1   :  { %14 = vsyncpa [#allocation7], 0  ;;  %s40_s29 = sshll.u32 %s2924_s5, 4  ;;  %s2294_s30 = smov [#allocation6]   ;;  %s41_s29 = int_to_ptr.hbm [resolvable:$true] %s40_s29 }
   0x2   :  { %s42_s9 = sshll.u32 %s2294_s30, 4  ;;  %s27_s12 = sshll.u32 %s2923_s4, 4  ;;  %s43_s9 = int_to_ptr.vmem [resolvable:$true] %s42_s9  ;;  %s28_s12 = int_to_ptr.hbm [resolvable:$true] %s27_s12 }
   0x3   :  { %s2295_s13 = smov 64   ;;  %s2296_s14 = smov 4  }
   0x4   :  { %48 = dma.hbm_to_vmem [thread:$0]  %s41_s29, 512, %s43_s9, [#allocation7], %s2295_s13, %s2295_s13, %s2296_s14  }
   0x5   :  { %s2297_s15 = smov [#allocation4]   ;;  %s2298_s17 = smov 256  }
   0x6   :  { %s29_s16 = sshll.u32 %s2297_s15, 4  ;;  %s2299_s18 = smov 16   ;;  %s30_s16 = int_to_ptr.vmem [resolvable:$true] %s29_s16 }
   0x7   :  { %35 = dma.hbm_to_vmem [thread:$0]  %s28_s12, 2048, %s30_s16, [#allocation5], %s2298_s17, %s2298_s17, %s2299_s18  }
   0x8   :  { %s53_s20 = sshll.u32 %s2925_s6, 4  ;;  %s2300_s21 = smov [#allocation8]   ;;  %s54_s20 = int_to_ptr.hbm [resolvable:$true] %s53_s20 }
   0x9   :  { %s55_s22 = sshll.u32 %s2300_s21, 4  ;;  %s56_s22 = int_to_ptr.vmem [resolvable:$true] %s55_s22 }
   0xa   :  { %61 = dma.hbm_to_vmem [thread:$0]  %s54_s20, 512, %s56_s22, [#allocation7], %s2295_s13, %s2295_s13, %s2296_s14  }
   0xb   :  { %2290 = dma.done.wait [#allocation5], 2048  }
   0xc   :  { %2291 = vsyncadd [#allocation5], 4294965248 }
   0xd   :  { %2292 = dma.done.wait [#allocation7], 1024  }
   0xe   :  { %2293 = vsyncadd [#allocation7], 4294966272  ;;  %v2363_v0 = vld [vmem:[%s2921_s2] sm:$0xf]  ;;  %vm91_vm0 = vcmask 1041408   ;;  %vm87_vm1 = vcmask 31744  }
   0xf   :  { %84 = vst [vmem:[#allocation1] ss:$4 sm:$0xff] %v2363_v0  ;;  %v2369_v1 = vld [vmem:[%s2920_s1] sm:$0xf]  ;;  %v1998_v6 = vld [vmem:[%s2919_s0 + $0x7] sm:$0x1] }
  0x10   :  { %v80_v11 = vld [vmem:[%s2919_s0] sm:$0x1]  ;;  %v2004_v16 = vld [vmem:[%s2919_s0 + $0x6] sm:$0x1]  ;;  %v2003_v21 = vld [vmem:[%s2919_s0 + $0x1] sm:$0x1] }
  0x11   :  { %v2010_v26 = vld [vmem:[%s2919_s0 + $0x5] sm:$0x1]  ;;  %v2009_v31 = vld [vmem:[%s2919_s0 + $0x2] sm:$0x1]  ;;  %v2016_v36 = vld [vmem:[%s2919_s0 + $0x4] sm:$0x1] }
  0x12   :  { %v2015_v41 = vld [vmem:[%s2919_s0 + $0x3] sm:$0x1]  ;;  %v2021_v51 = vld [vmem:[%s2919_s0 + $0x4] sm:$0x1]  ;;  %v2028_v56 = vld [vmem:[%s2919_s0 + $0x2] sm:$0x1] }
  0x13   :  { %v2022_v46 = vld [vmem:[%s2919_s0 + $0x3] sm:$0x1]  ;;  %v2027_v61 = vld [vmem:[%s2919_s0 + $0x5] sm:$0x1]  ;;  %vm882_vm7 = vcmask 517120   ;;  %vm781_vm8 = vcmask 523264  }
  0x16   :  { %v86_v2 = vld.sshfl [vmem:[#allocation1 + $0x8] sm:$0xff pattern:$0x73625140]  ;;  %v85_v3 = vld.sshfl [vmem:[#allocation1] sm:$0xff pattern:$0x73625140] }
  0x17   :  { %v94_v4 = vsel %vm91_vm0, %v86_v2, 0  ;;  %v92_v5 = vsel %vm91_vm0, %v85_v3, 0  ;;  %123 = vst [vmem:[#allocation1] ss:$4 sm:$0xff] %v2369_v1 }
  0x18   :  { %116 = vmatpush.bf16.msra.mxu1 %v94_v4  ;;  %103 = vmatpush.bf16.msra.mxu0 %v92_v5  ;;  %v2034_v4 = vld [vmem:[%s2919_s0 + $0x1] sm:$0x1] }
  0x1b   :  { %2000 = vmatmul.msk.bf16.vlgmr.msra.gmra.mxu1 %vm87_vm1, %v1998_v6  ;;  %1999 = vmatmul.msk.bf16.vlgmr.msra.gmra.mxu0 %vm87_vm1, %v1998_v6 }
  0x1e   :  { %v125_v7 = vld.sshfl [vmem:[#allocation1 + $0x8] sm:$0xff pattern:$0x73625140]  ;;  %v124_v8 = vld.sshfl [vmem:[#allocation1] sm:$0xff pattern:$0x73625140] }
  0x1f   :  { %v131_v9 = vsel %vm91_vm0, %v125_v7, 0  ;;  %v129_v10 = vsel %vm91_vm0, %v124_v8, 0  ;;  %176 = vst [vmem:[#allocation1] ss:$4 sm:$0xff] %v2363_v0 }
  0x20   :  { %153 = vmatpush.bf16.msra.mxu3 %v131_v9  ;;  %140 = vmatpush.bf16.msra.mxu2 %v129_v10  ;;  %v2033_v9 = vld [vmem:[%s2919_s0 + $0x6] sm:$0x1]  ;;  %v2483_v10 = vld [vmem:[#allocation4 + $0x78] sm:$0xff] }
  0x23   :  { %2002 = vmatmul.msk.bf16.vlgmr.msra.gmra.mxu3 %vm87_vm1, %v80_v11  ;;  %2001 = vmatmul.msk.bf16.vlgmr.msra.gmra.mxu2 %vm87_vm1, %v80_v11  ;;  %v2485_v11 = vld [vmem:[#allocation4 + $0x70] sm:$0xff] }
  0x26   :  { %v178_v12 = vld.sshfl [vmem:[#allocation1 + $0x8] sm:$0xff pattern:$0x73625140]  ;;  %v177_v13 = vld.sshfl [vmem:[#allocation1] sm:$0xff pattern:$0x73625140] }
  0x27   :  { %v184_v14 = vsel %vm91_vm0, %v178_v12, 0  ;;  %v182_v15 = vsel %vm91_vm0, %v177_v13, 0  ;;  %212 = vst [vmem:[#allocation1] ss:$4 sm:$0xff] %v2369_v1 }
  0x28   :  { %206 = vmatpush.bf16.msrb.mxu1 %v184_v14  ;;  %193 = vmatpush.bf16.msrb.mxu0 %v182_v15  ;;  %v677_v15 = vld [vmem:[%s2919_s0] sm:$0x1] }
  0x2b   :  { %2006 = vmatmul.msk.bf16.vlgmr.msrb.gmra.mxu1 %vm87_vm1, %v2004_v16  ;;  %2005 = vmatmul.msk.bf16.vlgmr.msrb.gmra.mxu0 %vm87_vm1, %v2004_v16  ;;  %v2495_v16 = vld [vmem:[#allocation4 + $0x68] sm:$0xff] }
  0x2e   :  { %v214_v17 = vld.sshfl [vmem:[#allocation1 + $0x8] sm:$0xff pattern:$0x73625140]  ;;  %v213_v18 = vld.sshfl [vmem:[#allocation1] sm:$0xff pattern:$0x73625140] }
  0x2f   :  { %v220_v19 = vsel %vm91_vm0, %v214_v17, 0  ;;  %v218_v20 = vsel %vm91_vm0, %v213_v18, 0  ;;  %261 = vst [vmem:[#allocation1] ss:$4 sm:$0xff] %v2363_v0  ;;  %v2497_v17 = vld [vmem:[#allocation4 + $0x60] sm:$0xff]  ;;  %v2501_v18 = vld [vmem:[#allocation4 + $0x58] sm:$0xff] }
  0x30   :  { %242 = vmatpush.bf16.msrb.mxu3 %v220_v19  ;;  %229 = vmatpush.bf16.msrb.mxu2 %v218_v20  ;;  %v2507_v19 = vld [vmem:[#allocation4 + $0x48] sm:$0xff]  ;;  %v2509_v20 = vld [vmem:[#allocation4 + $0x40] sm:$0xff] }
  0x33   :  { %2008 = vmatmul.msk.bf16.vlgmr.msrb.gmra.mxu3 %vm87_vm1, %v2003_v21  ;;  %2007 = vmatmul.msk.bf16.vlgmr.msrb.gmra.mxu2 %vm87_vm1, %v2003_v21 }
  0x36   :  { %v263_v22 = vld.sshfl [vmem:[#allocation1 + $0x8] sm:$0xff pattern:$0x73625140]  ;;  %v262_v23 = vld.sshfl [vmem:[#allocation1] sm:$0xff pattern:$0x73625140] }
  0x37   :  { %v269_v24 = vsel %vm91_vm0, %v263_v22, 0  ;;  %v267_v25 = vsel %vm91_vm0, %v262_v23, 0  ;;  %297 = vst [vmem:[#allocation1] ss:$4 sm:$0xff] %v2369_v1 }
  0x38   :  { %291 = vmatpush.bf16.msra.mxu1 %v269_v24  ;;  %278 = vmatpush.bf16.msra.mxu0 %v267_v25  ;;  %v2039_v25 = vld [vmem:[%s2919_s0 + $0x7] sm:$0x1] }
  0x3b   :  { %2012 = vmatmul.msk.bf16.vlgmr.msra.gmra.mxu1 %vm87_vm1, %v2010_v26  ;;  %2011 = vmatmul.msk.bf16.vlgmr.msra.gmra.mxu0 %vm87_vm1, %v2010_v26  ;;  %v2520_v26 = vld [vmem:[#allocation4 + $0x38] sm:$0xff] }
  0x3e   :  { %v299_v27 = vld.sshfl [vmem:[#allocation1 + $0x8] sm:$0xff pattern:$0x73625140]  ;;  %v298_v28 = vld.sshfl [vmem:[#allocation1] sm:$0xff pattern:$0x73625140] }
  0x3f   :  { %v305_v29 = vsel %vm91_vm0, %v299_v27, 0  ;;  %v303_v30 = vsel %vm91_vm0, %v298_v28, 0  ;;  %346 = vst [vmem:[#allocation1] ss:$4 sm:$0xff] %v2363_v0  ;;  %v2522_v27 = vld [vmem:[#allocation4 + $0x30] sm:$0xff]  ;;  %v2528_v28 = vld [vmem:[#allocation4 + $0x28] sm:$0xff] }
  0x40   :  { %327 = vmatpush.bf16.msra.mxu3 %v305_v29  ;;  %314 = vmatpush.bf16.msra.mxu2 %v303_v30  ;;  %v2530_v29 = vld [vmem:[#allocation4 + $0x20] sm:$0xff]  ;;  %v2534_v30 = vld [vmem:[#allocation4 + $0x18] sm:$0xff] }
  0x43   :  { %2014 = vmatmul.msk.bf16.vlgmr.msra.gmra.mxu3 %vm87_vm1, %v2009_v31  ;;  %2013 = vmatmul.msk.bf16.vlgmr.msra.gmra.mxu2 %vm87_vm1, %v2009_v31  ;;  %v2536_v31 = vld [vmem:[#allocation4 + $0x10] sm:$0xff] }
  0x46   :  { %v348_v32 = vld.sshfl [vmem:[#allocation1 + $0x8] sm:$0xff pattern:$0x73625140]  ;;  %v347_v33 = vld.sshfl [vmem:[#allocation1] sm:$0xff pattern:$0x73625140] }
  0x47   :  { %v354_v34 = vsel %vm91_vm0, %v348_v32, 0  ;;  %v352_v35 = vsel %vm91_vm0, %v347_v33, 0  ;;  %382 = vst [vmem:[#allocation1] ss:$4 sm:$0xff] %v2369_v1  ;;  %v2542_v32 = vld [vmem:[#allocation4 + $0x8] sm:$0xff]  ;;  %v2544_v33 = vld [vmem:[#allocation4] sm:$0xff] }
  0x48   :  { %376 = vmatpush.bf16.msrb.mxu1 %v354_v34  ;;  %363 = vmatpush.bf16.msrb.mxu0 %v352_v35 }
  0x4b   :  { %2018 = vmatmul.msk.bf16.vlgmr.msrb.gmra.mxu1 %vm87_vm1, %v2016_v36  ;;  %2017 = vmatmul.msk.bf16.vlgmr.msrb.gmra.mxu0 %vm87_vm1, %v2016_v36  ;;  %v2301_v36 = vmov 0.0  }
  0x4e   :  { %v384_v37 = vld.sshfl [vmem:[#allocation1 + $0x8] sm:$0xff pattern:$0x73625140]  ;;  %v383_v38 = vld.sshfl [vmem:[#allocation1] sm:$0xff pattern:$0x73625140] }
  0x4f   :  { %v390_v39 = vsel %vm91_vm0, %v384_v37, 0  ;;  %v388_v40 = vsel %vm91_vm0, %v383_v38, 0  ;;  %429 = vst [vmem:[#allocation1] ss:$4 sm:$0xff] %v2363_v0 }
  0x50   :  { %412 = vmatpush.bf16.msrb.mxu3 %v390_v39  ;;  %399 = vmatpush.bf16.msrb.mxu2 %v388_v40  ;;  %v79_v39 = vld [vmem:[%s2922_s3] sm:$0x3] }
  0x51   :  { %v2575_v40 = vperm.slane %v79_v39, 1 }
  0x53   :  { %2020 = vmatmul.msk.bf16.vlgmr.msrb.gmra.mxu3 %vm87_vm1, %v2015_v41  ;;  %2019 = vmatmul.msk.bf16.vlgmr.msrb.gmra.mxu2 %vm87_vm1, %v2015_v41 }
  0x56   :  { %v431_v42 = vld.sshfl [vmem:[#allocation1 + $0x8] sm:$0xff pattern:$0x73625140]  ;;  %v430_v43 = vld.sshfl [vmem:[#allocation1] sm:$0xff pattern:$0x73625140] }
  0x57   :  { %v437_v44 = vsel %vm91_vm0, %v431_v42, 0  ;;  %v435_v45 = vsel %vm91_vm0, %v430_v43, 0  ;;  %465 = vst [vmem:[#allocation1] ss:$4 sm:$0xff] %v2369_v1 }
  0x58   :  { %459 = vmatpush.bf16.msra.mxu1 %v437_v44  ;;  %446 = vmatpush.bf16.msra.mxu0 %v435_v45  ;;  %v2581_v45 = vperm.slane %v79_v39, 0 }
  0x5b   :  { %2024 = vmatmul.msk.bf16.vlgmr.msra.gmra.mxu1 %vm87_vm1, %v2022_v46  ;;  %2023 = vmatmul.msk.bf16.vlgmr.msra.gmra.mxu0 %vm87_vm1, %v2022_v46 }
  0x5e   :  { %v467_v47 = vld.sshfl [vmem:[#allocation1 + $0x8] sm:$0xff pattern:$0x73625140]  ;;  %v466_v48 = vld.sshfl [vmem:[#allocation1] sm:$0xff pattern:$0x73625140] }
  0x5f   :  { %v473_v49 = vsel %vm91_vm0, %v467_v47, 0  ;;  %v471_v50 = vsel %vm91_vm0, %v466_v48, 0  ;;  %512 = vst [vmem:[#allocation1] ss:$4 sm:$0xff] %v2363_v0 }
  0x60   :  { %495 = vmatpush.bf16.msra.mxu3 %v473_v49  ;;  %482 = vmatpush.bf16.msra.mxu2 %v471_v50 }
  0x63   :  { %2026 = vmatmul.msk.bf16.vlgmr.msra.gmra.mxu3 %vm87_vm1, %v2021_v51  ;;  %2025 = vmatmul.msk.bf16.vlgmr.msra.gmra.mxu2 %vm87_vm1, %v2021_v51 }
  0x66   :  { %v514_v52 = vld.sshfl [vmem:[#allocation1 + $0x8] sm:$0xff pattern:$0x73625140]  ;;  %v513_v53 = vld.sshfl [vmem:[#allocation1] sm:$0xff pattern:$0x73625140] }
  0x67   :  { %v520_v54 = vsel %vm91_vm0, %v514_v52, 0  ;;  %v518_v55 = vsel %vm91_vm0, %v513_v53, 0  ;;  %548 = vst [vmem:[#allocation1] ss:$4 sm:$0xff] %v2369_v1 }
  0x68   :  { %542 = vmatpush.bf16.msrb.mxu1 %v520_v54  ;;  %529 = vmatpush.bf16.msrb.mxu0 %v518_v55 }
  0x6b   :  { %2030 = vmatmul.msk.bf16.vlgmr.msrb.gmra.mxu1 %vm87_vm1, %v2028_v56  ;;  %2029 = vmatmul.msk.bf16.vlgmr.msrb.gmra.mxu0 %vm87_vm1, %v2028_v56 }
  0x6e   :  { %v550_v57 = vld.sshfl [vmem:[#allocation1 + $0x8] sm:$0xff pattern:$0x73625140]  ;;  %v549_v58 = vld.sshfl [vmem:[#allocation1] sm:$0xff pattern:$0x73625140] }
  0x6f   :  { %v556_v59 = vsel %vm91_vm0, %v550_v57, 0  ;;  %v554_v60 = vsel %vm91_vm0, %v549_v58, 0  ;;  %595 = vst [vmem:[#allocation1] ss:$4 sm:$0xff] %v2363_v0 }
  0x70   :  { %578 = vmatpush.bf16.msrb.mxu3 %v556_v59  ;;  %565 = vmatpush.bf16.msrb.mxu2 %v554_v60 }
  0x73   :  { %2032 = vmatmul.msk.bf16.vlgmr.msrb.gmra.mxu3 %vm87_vm1, %v2027_v61  ;;  %2031 = vmatmul.msk.bf16.vlgmr.msrb.gmra.mxu2 %vm87_vm1, %v2027_v61 }
  0x76   :  { %v597_v62 = vld.sshfl [vmem:[#allocation1 + $0x8] sm:$0xff pattern:$0x73625140]  ;;  %v596_v63 = vld.sshfl [vmem:[#allocation1] sm:$0xff pattern:$0x73625140] }
  0x77   :  { %v603_v2 = vsel %vm91_vm0, %v597_v62, 0  ;;  %v601_v3 = vsel %vm91_vm0, %v596_v63, 0  ;;  %631 = vst [vmem:[#allocation1] ss:$4 sm:$0xff] %v2369_v1 }
  0x78   :  { %625 = vmatpush.bf16.msra.mxu1 %v603_v2  ;;  %612 = vmatpush.bf16.msra.mxu0 %v601_v3 }
  0x7b   :  { %2036 = vmatmul.msk.bf16.vlgmr.msra.gmra.mxu1 %vm87_vm1, %v2034_v4  ;;  %2035 = vmatmul.msk.bf16.vlgmr.msra.gmra.mxu0 %vm87_vm1, %v2034_v4 }
  0x7e   :  { %v633_v5 = vld.sshfl [vmem:[#allocation1 + $0x8] sm:$0xff pattern:$0x73625140]  ;;  %v632_v6 = vld.sshfl [vmem:[#allocation1] sm:$0xff pattern:$0x73625140] }
  0x7f   :  { %v639_v7 = vsel %vm91_vm0, %v633_v5, 0  ;;  %v637_v8 = vsel %vm91_vm0, %v632_v6, 0  ;;  %678 = vst [vmem:[#allocation1] ss:$4 sm:$0xff] %v2363_v0 }
  0x80   :  { %661 = vmatpush.bf16.msra.mxu3 %v639_v7  ;;  %648 = vmatpush.bf16.msra.mxu2 %v637_v8 }
  0x83   :  { %2038 = vmatmul.msk.bf16.vlgmr.msra.gmra.mxu3 %vm87_vm1, %v2033_v9  ;;  %2037 = vmatmul.msk.bf16.vlgmr.msra.gmra.mxu2 %vm87_vm1, %v2033_v9 }
  0x86   :  { %v680_v12 = vld.sshfl [vmem:[#allocation1 + $0x8] sm:$0xff pattern:$0x73625140]  ;;  %v679_v13 = vld.sshfl [vmem:[#allocation1] sm:$0xff pattern:$0x73625140] }
  0x87   :  { %v686_v14 = vsel %vm91_vm0, %v680_v12, 0  ;;  %v684_v0 = vsel %vm91_vm0, %v679_v13, 0  ;;  %714 = vst [vmem:[#allocation1] ss:$4 sm:$0xff] %v2369_v1  ;;  %v2503_v1 = vld [vmem:[#allocation4 + $0x50] sm:$0xff] }
  0x88   :  { %708 = vmatpush.bf16.msrb.mxu1 %v686_v14  ;;  %695 = vmatpush.bf16.msrb.mxu0 %v684_v0 }
  0x8b   :  { %2041 = vmatmul.msk.bf16.vlgmr.msrb.gmra.mxu1 %vm87_vm1, %v677_v15  ;;  %2040 = vmatmul.msk.bf16.vlgmr.msrb.gmra.mxu0 %vm87_vm1, %v677_v15 }
  0x8c   :  { %813 = vmatpush.msra.mxu1 %v2483_v10  ;;  %793 = vmatpush.msra.mxu0 %v2485_v11 }
  0x8e   :  { %814 = vmatpush.msra.mxu1 %v2495_v16  ;;  %794 = vmatpush.msra.mxu0 %v2497_v17  ;;  %v716_v21 = vld.sshfl [vmem:[#allocation1 + $0x8] sm:$0xff pattern:$0x73625140]  ;;  %v715_v22 = vld.sshfl [vmem:[#allocation1] sm:$0xff pattern:$0x73625140] }
  0x8f   :  { %v722_v23 = vsel %vm91_vm0, %v716_v21, 0  ;;  %v720_v24 = vsel %vm91_vm0, %v715_v22, 0 }
  0x90   :  { %815 = vmatpush.msra.mxu1 %v2501_v18  ;;  %795 = vmatpush.msra.mxu0 %v2503_v1 }
  0x91   :  { %744 = vmatpush.bf16.msrb.mxu3 %v722_v23  ;;  %731 = vmatpush.bf16.msrb.mxu2 %v720_v24 }
  0x92   :  { %816 = vmatpush.msra.mxu1 %v2507_v19  ;;  %796 = vmatpush.msra.mxu0 %v2509_v20 }
  0x94   :  { %2043 = vmatmul.msk.bf16.vlgmr.msrb.gmra.mxu3 %vm87_vm1, %v2039_v25  ;;  %2042 = vmatmul.msk.bf16.vlgmr.msrb.gmra.mxu2 %vm87_vm1, %v2039_v25 }
  0x95   :  { %896 = vmatpush.msra.mxu2 %v2485_v11  ;;  %916 = vmatpush.msra.mxu3 %v2483_v10 }
  0x96   :  { %817 = vmatpush.msra.mxu1 %v2520_v26  ;;  %797 = vmatpush.msra.mxu0 %v2522_v27 }
  0x97   :  { %897 = vmatpush.msra.mxu2 %v2497_v17  ;;  %917 = vmatpush.msra.mxu3 %v2495_v16 }
  0x98   :  { %818 = vmatpush.msra.mxu1 %v2528_v28  ;;  %798 = vmatpush.msra.mxu0 %v2530_v29  ;;  %v118_v34 = vpop.f32.mrf.mxu1  ;;  %v105_v35 = vpop.f32.mrf.mxu0 }
  0x99   :  { %898 = vmatpush.msra.mxu2 %v2503_v1  ;;  %918 = vmatpush.msra.mxu3 %v2501_v18 }
  0x9a   :  { %819 = vmatpush.msra.mxu1 %v2534_v30  ;;  %799 = vmatpush.msra.mxu0 %v2536_v31 }
  0x9b   :  { %899 = vmatpush.msra.mxu2 %v2509_v20  ;;  %919 = vmatpush.msra.mxu3 %v2507_v19 }
  0x9c   :  { %820 = vmatpush.msra.mxu1 %v2542_v32  ;;  %800 = vmatpush.msra.mxu0 %v2544_v33 }
  0x9d   :  { %821 = vmatmul.f32.vlgmr.msra.gmra.mxu1 %v2301_v36  ;;  %801 = vmatmul.f32.vlgmr.msra.gmra.mxu0 %v2301_v36 }
  0x9e   :  { %900 = vmatpush.msra.mxu2 %v2522_v27  ;;  %920 = vmatpush.msra.mxu3 %v2520_v26 }
  0x9f   :  { %999 = vmatpush.msrb.mxu0 %v2485_v11  ;;  %1019 = vmatpush.msrb.mxu1 %v2483_v10 }
  0xa0   :  { %901 = vmatpush.msra.mxu2 %v2530_v29  ;;  %921 = vmatpush.msra.mxu3 %v2528_v28  ;;  %v120_v37 = vpop.f32.mrf.mxu1  ;;  %v107_v38 = vpop.f32.mrf.mxu0 }
  0xa1   :  { %1000 = vmatpush.msrb.mxu0 %v2497_v17  ;;  %1020 = vmatpush.msrb.mxu1 %v2495_v16 }
  0xa2   :  { %902 = vmatpush.msra.mxu2 %v2536_v31  ;;  %922 = vmatpush.msra.mxu3 %v2534_v30 }
  0xa3   :  { %1001 = vmatpush.msrb.mxu0 %v2503_v1  ;;  %1021 = vmatpush.msrb.mxu1 %v2501_v18 }
  0xa4   :  { %903 = vmatpush.msra.mxu2 %v2544_v33  ;;  %923 = vmatpush.msra.mxu3 %v2542_v32 }
  0xa5   :  { %1002 = vmatpush.msrb.mxu0 %v2509_v20  ;;  %1022 = vmatpush.msrb.mxu1 %v2507_v19 }
  0xa6   :  { %1102 = vmatpush.msrb.mxu2 %v2485_v11  ;;  %1122 = vmatpush.msrb.mxu3 %v2483_v10  ;;  %v155_v41 = vpop.f32.mrf.mxu3  ;;  %v142_v42 = vpop.f32.mrf.mxu2 }
  0xa7   :  { %1003 = vmatpush.msrb.mxu0 %v2522_v27  ;;  %1023 = vmatpush.msrb.mxu1 %v2520_v26  ;;  %v156_v43 = vadd.f32 %v155_v41, %v118_v34  ;;  %v143_v44 = vadd.f32 %v142_v42, %v105_v35 }
  0xa8   :  { %1103 = vmatpush.msrb.mxu2 %v2497_v17  ;;  %1123 = vmatpush.msrb.mxu3 %v2495_v16  ;;  %v208_v46 = vpop.f32.mrf.mxu1  ;;  %v195_v47 = vpop.f32.mrf.mxu0 }
  0xa9   :  { %1004 = vmatpush.msrb.mxu0 %v2530_v29  ;;  %1024 = vmatpush.msrb.mxu1 %v2528_v28  ;;  %v165_v48 = vadd.f32 %v2575_v40, %v156_v43  ;;  %v164_v50 = vadd.f32 %v2581_v45, %v143_v44 }
  0xaa   :  { %1104 = vmatpush.msrb.mxu2 %v2503_v1  ;;  %1124 = vmatpush.msrb.mxu3 %v2501_v18 }
  0xab   :  { %1005 = vmatpush.msrb.mxu0 %v2536_v31  ;;  %1025 = vmatpush.msrb.mxu1 %v2534_v30  ;;  %v168_v49 = vrot.slane %v165_v48, 6 }
  0xac   :  { %1105 = vmatpush.msrb.mxu2 %v2509_v20  ;;  %1125 = vmatpush.msrb.mxu3 %v2507_v19 }
  0xad   :  { %1006 = vmatpush.msrb.mxu0 %v2544_v33  ;;  %1026 = vmatpush.msrb.mxu1 %v2542_v32  ;;  %v169_v51 = vsel %vm91_vm0, %v164_v50, %v168_v49 }
  0xae   :  { %1106 = vmatpush.msrb.mxu2 %v2522_v27  ;;  %1126 = vmatpush.msrb.mxu3 %v2520_v26  ;;  %171 = vst [vmem:[#allocation2] sm:$0xf] %v169_v51  ;;  %v157_v52 = vpop.f32.mrf.mxu3  ;;  %v144_v53 = vpop.f32.mrf.mxu2 }
  0xaf   :  { %1205 = vmatpush.msra.mxu0 %v2485_v11  ;;  %1225 = vmatpush.msra.mxu1 %v2483_v10 }
  0xb0   :  { %1107 = vmatpush.msrb.mxu2 %v2530_v29  ;;  %1127 = vmatpush.msrb.mxu3 %v2528_v28  ;;  %v210_v54 = vpop.f32.mrf.mxu1  ;;  %v197_v55 = vpop.f32.mrf.mxu0 }
  0xb1   :  { %1206 = vmatpush.msra.mxu0 %v2497_v17  ;;  %1226 = vmatpush.msra.mxu1 %v2495_v16 }
  0xb2   :  { %1108 = vmatpush.msrb.mxu2 %v2536_v31  ;;  %1128 = vmatpush.msrb.mxu3 %v2534_v30 }
  0xb3   :  { %1207 = vmatpush.msra.mxu0 %v2503_v1  ;;  %1227 = vmatpush.msra.mxu1 %v2501_v18 }
  0xb4   :  { %1109 = vmatpush.msrb.mxu2 %v2544_v33  ;;  %1129 = vmatpush.msrb.mxu3 %v2542_v32 }
  0xb5   :  { %1208 = vmatpush.msra.mxu0 %v2509_v20  ;;  %1228 = vmatpush.msra.mxu1 %v2507_v19 }
  0xb6   :  { %v244_v56 = vpop.f32.mrf.mxu3  ;;  %v231_v57 = vpop.f32.mrf.mxu2 }
  0xb7   :  { %1209 = vmatpush.msra.mxu0 %v2522_v27  ;;  %1229 = vmatpush.msra.mxu1 %v2520_v26  ;;  %v245_v58 = vadd.f32 %v244_v56, %v208_v46  ;;  %v232_v59 = vadd.f32 %v231_v57, %v195_v47 }
  0xb8   :  { %v293_v60 = vpop.f32.mrf.mxu1  ;;  %v280_v61 = vpop.f32.mrf.mxu0 }
  0xb9   :  { %1210 = vmatpush.msra.mxu0 %v2530_v29  ;;  %1230 = vmatpush.msra.mxu1 %v2528_v28  ;;  %v249_v62 = vadd.f32 %v245_v58, %v2575_v40  ;;  %v248_v2 = vadd.f32 %v232_v59, %v2581_v45 }
  0xbb   :  { %1211 = vmatpush.msra.mxu0 %v2536_v31  ;;  %1231 = vmatpush.msra.mxu1 %v2534_v30  ;;  %v252_v63 = vrot.slane %v249_v62, 6 }
  0xbd   :  { %1212 = vmatpush.msra.mxu0 %v2544_v33  ;;  %1232 = vmatpush.msra.mxu1 %v2542_v32  ;;  %v253_v3 = vsel %vm91_vm0, %v248_v2, %v252_v63 }
  0xbe   :  { %256 = vst [vmem:[#allocation2 + $0x4] sm:$0xf] %v253_v3  ;;  %v246_v4 = vpop.f32.mrf.mxu3  ;;  %v233_v5 = vpop.f32.mrf.mxu2 }
  0xc0   :  { %v295_v6 = vpop.f32.mrf.mxu1  ;;  %v282_v7 = vpop.f32.mrf.mxu0 }
  0xc6   :  { %v329_v8 = vpop.f32.mrf.mxu3  ;;  %v316_v9 = vpop.f32.mrf.mxu2 }
  0xc7   :  { %v330_v12 = vadd.f32 %v329_v8, %v293_v60  ;;  %v317_v13 = vadd.f32 %v316_v9, %v280_v61 }
  0xc8   :  { %v378_v14 = vpop.f32.mrf.mxu1  ;;  %v365_v0 = vpop.f32.mrf.mxu0 }
  0xc9   :  { %v334_v15 = vadd.f32 %v330_v12, %v2575_v40  ;;  %v333_v22 = vadd.f32 %v317_v13, %v2581_v45 }
  0xcb   :  { %v337_v21 = vrot.slane %v334_v15, 6 }
  0xcd   :  { %v338_v23 = vsel %vm91_vm0, %v333_v22, %v337_v21 }
  0xce   :  { %341 = vst [vmem:[#allocation2 + $0x8] sm:$0xf] %v338_v23  ;;  %v331_v24 = vpop.f32.mrf.mxu3  ;;  %v318_v25 = vpop.f32.mrf.mxu2 }
  0xd0   :  { %v380_v34 = vpop.f32.mrf.mxu1  ;;  %v367_v35 = vpop.f32.mrf.mxu0 }
  0xd6   :  { %v414_v36 = vpop.f32.mrf.mxu3  ;;  %v401_v37 = vpop.f32.mrf.mxu2 }
  0xd7   :  { %v415_v38 = vadd.f32 %v414_v36, %v378_v14  ;;  %v402_v39 = vadd.f32 %v401_v37, %v365_v0 }
  0xd8   :  { %v461_v41 = vpop.f32.mrf.mxu1  ;;  %v448_v42 = vpop.f32.mrf.mxu0 }
  0xd9   :  { %v419_v43 = vadd.f32 %v415_v38, %v2575_v40  ;;  %v418_v46 = vadd.f32 %v402_v39, %v2581_v45 }
  0xdb   :  { %v422_v44 = vrot.slane %v419_v43, 6 }
  0xdd   :  { %v423_v47 = vsel %vm91_vm0, %v418_v46, %v422_v44 }
  0xde   :  { %426 = vst [vmem:[#allocation2 + $0xc] sm:$0xf] %v423_v47  ;;  %v416_v48 = vpop.f32.mrf.mxu3  ;;  %v403_v49 = vpop.f32.mrf.mxu2 }
  0xe0   :  { %v463_v50 = vpop.f32.mrf.mxu1  ;;  %v450_v51 = vpop.f32.mrf.mxu0 }
  0xe6   :  { %v497_v52 = vpop.f32.mrf.mxu3  ;;  %v484_v53 = vpop.f32.mrf.mxu2 }
  0xe7   :  { %v498_v54 = vadd.f32 %v497_v52, %v461_v41  ;;  %v485_v55 = vadd.f32 %v484_v53, %v448_v42 }
  0xe8   :  { %v544_v56 = vpop.f32.mrf.mxu1  ;;  %v531_v57 = vpop.f32.mrf.mxu0 }
  0xe9   :  { %v502_v58 = vadd.f32 %v498_v54, %v2575_v40  ;;  %v501_v60 = vadd.f32 %v485_v55, %v2581_v45 }
  0xeb   :  { %v505_v59 = vrot.slane %v502_v58, 6  ;;  %v780_v58 = vld [vmem:[#allocation2] sm:$0xf] }
  0xed   :  { %v506_v61 = vsel %vm91_vm0, %v501_v60, %v505_v59 }
  0xee   :  { %509 = vst [vmem:[#allocation2 + $0x10] sm:$0xf] %v506_v61  ;;  %v499_v62 = vpop.f32.mrf.mxu3  ;;  %v486_v63 = vpop.f32.mrf.mxu2 }
  0xf0   :  { %v546_v2 = vpop.f32.mrf.mxu1  ;;  %v533_v3 = vpop.f32.mrf.mxu0 }
  0xf6   :  { %v580_v4 = vpop.f32.mrf.mxu3  ;;  %v567_v5 = vpop.f32.mrf.mxu2 }
  0xf7   :  { %v581_v6 = vadd.f32 %v580_v4, %v544_v56  ;;  %v568_v7 = vadd.f32 %v567_v5, %v531_v57 }
  0xf8   :  { %v627_v8 = vpop.f32.mrf.mxu1  ;;  %v614_v9 = vpop.f32.mrf.mxu0 }
  0xf9   :  { %v585_v12 = vadd.f32 %v581_v6, %v2575_v40  ;;  %v584_v14 = vadd.f32 %v568_v7, %v2581_v45 }
  0xfb   :  { %v588_v13 = vrot.slane %v585_v12, 6 }
  0xfd   :  { %v589_v0 = vsel %vm91_vm0, %v584_v14, %v588_v13 }
  0xfe   :  { %592 = vst [vmem:[#allocation2 + $0x14] sm:$0xf] %v589_v0  ;;  %v582_v15 = vpop.f32.mrf.mxu3  ;;  %v569_v21 = vpop.f32.mrf.mxu2 }
 0x100   :  { %v629_v22 = vpop.f32.mrf.mxu1  ;;  %v616_v23 = vpop.f32.mrf.mxu0 }
 0x106   :  { %v663_v24 = vpop.f32.mrf.mxu3  ;;  %v650_v25 = vpop.f32.mrf.mxu2 }
 0x107   :  { %v664_v34 = vadd.f32 %v663_v24, %v627_v8  ;;  %v651_v35 = vadd.f32 %v650_v25, %v614_v9  ;;  %v775_v8 = vlaneseq }
 0x108   :  { %v710_v36 = vpop.f32.mrf.mxu1  ;;  %v697_v37 = vpop.f32.mrf.mxu0 }
 0x109   :  { %v668_v38 = vadd.f32 %v664_v34, %v2575_v40  ;;  %v667_v41 = vadd.f32 %v651_v35, %v2581_v45  ;;  %v776_v0 = vand.u32 127, %v775_v8 }
 0x10b   :  { %v671_v39 = vrot.slane %v668_v38, 6  ;;  %v2642_v23 = vadd.s32 128, %v776_v0 }
 0x10d   :  { %v672_v42 = vsel %vm91_vm0, %v667_v41, %v671_v39  ;;  %vm779_vm6 = vcmp.ge.s32.totalorder %v2642_v23, 192 }
 0x10e   :  { %675 = vst [vmem:[#allocation2 + $0x18] sm:$0xf] %v672_v42  ;;  %v665_v43 = vpop.f32.mrf.mxu3  ;;  %v652_v44 = vpop.f32.mrf.mxu2 }
 0x110   :  { %v712_v46 = vpop.f32.mrf.mxu1  ;;  %v699_v47 = vpop.f32.mrf.mxu0 }
 0x117   :  { %v746_v48 = vpop.f32.mrf.mxu3  ;;  %v733_v49 = vpop.f32.mrf.mxu2 }
 0x118   :  { %v747_v50 = vadd.f32 %v746_v48, %v710_v36  ;;  %v734_v51 = vadd.f32 %v733_v49, %v697_v37  ;;  %v884_v48 = vld [vmem:[#allocation2 + $0x4] sm:$0xf] }
 0x11a   :  { %v822_v52 = vpop.f32.mrf.mxu1  ;;  %v802_v53 = vpop.f32.mrf.mxu0  ;;  %v751_v54 = vadd.f32 %v747_v50, %v2575_v40  ;;  %v750_v57 = vadd.f32 %v734_v51, %v2581_v45 }
 0x11b   :  { %v827_v55 = vrot.slane %v822_v52, 6 }
 0x11c   :  { %v754_v56 = vrot.slane %v751_v54, 6 }
 0x11d   :  { %v828_v59 = vsel %vm91_vm0, %v802_v53, %v827_v55 }
 0x11e   :  { %v830_v60 = vadd.f32 %v828_v59, %v780_v58  ;;  %v755_v61 = vsel %vm91_vm0, %v750_v57, %v754_v56 }
 0x11f   :  { %758 = vst [vmem:[#allocation2 + $0x1c] sm:$0xf] %v755_v61  ;;  %v735_v63 = vpop.f32.mrf.mxu2  ;;  %v748_v2 = vpop.f32.mrf.mxu3 }
 0x120   :  { %2138 = vtanh.f32 %v830_v60  ;;  %v2044_v62 = vmul.f32 -1.442695, %v830_v60 }
 0x122   :  { %2140 = vpow2.f32 %v2044_v62 }
 0x126   :  { %v2139_v3 = vpop.eup %2138 }
 0x127   :  { %852 = vst [vmem:[#allocation1] ss:$4 sm:$0xff] %v2139_v3 }
 0x128   :  { %v2141_v4 = vpop.eup %2140 }
 0x129   :  { %v835_v40 = vadd.f32 1.0, %v2141_v4 }
 0x12b   :  { %2142 = vrcp.f32 %v835_v40  ;;  %v847_v7 = vand.u32 2147483648, %v835_v40  ;;  %v845_v12 = vand.u32 2147483647, %v835_v40  ;;  %vm841_vm3 = vweird.f32 %v835_v40 }
 0x12d   :  { %v848_v14 = vor.u32 1.1754944e-38, %v847_v7  ;;  %vm846_vm5 = vcmp.eq.f32.partialorder %v845_v12, 8.507059e+37 }
 0x12e   :  { %v854_v22 = vld.sshfl [vmem:[#allocation1 + $0x8] sm:$0xff pattern:$0x73625140] }
 0x131   :  { %v2143_v5 = vpop.eup %2142 }
 0x132   :  { %v837_v6 = vmul.f32 %v2143_v5, %v835_v40  ;;  %vm842_vm2 = vweird.f32 %v2143_v5 }
 0x133   :  { %vm843_vm4 = vmor %vm841_vm3, %vm842_vm2 }
 0x134   :  { %v838_v45 = vsub.f32 1.0, %v837_v6 }
 0x136   :  { %v839_v9 = vmul.f32 %v2143_v5, %v838_v45 }
 0x138   :  { %v840_v13 = vadd.f32 %v2143_v5, %v839_v9 }
 0x13a   :  { %v844_v15 = vsel %vm843_vm4, %v2143_v5, %v840_v13 }
 0x13b   :  { %v849_v21 = vsel %vm846_vm5, %v848_v14, %v844_v15 }
 0x13c   :  { %858 = vst [vmem:[#allocation1] ss:$4 sm:$0xff] %v849_v21 }
 0x143   :  { %v860_v24 = vld.sshfl [vmem:[#allocation1 + $0x8] sm:$0xff pattern:$0x73625140]  ;;  %v859_v35 = vld.sshfl [vmem:[#allocation1] sm:$0xff pattern:$0x73625140] }
 0x144   :  { %v864_v25 = vsel %vm779_vm6, %v854_v22, %v860_v24  ;;  %v865_v37 = vmul.f32 0.0, %v859_v35  ;;  %v987_v22 = vld [vmem:[#allocation2 + $0x8] sm:$0xf] }
 0x145   :  { %867 = vrot.lane.b32.xlu0 %v864_v25, %s2295_s13 }
 0x1b7   :  { %v868_v34 = vpop.permute.xlu0 %867 }
 0x1b8   :  { %v870_v36 = vmul.f32 %v868_v34, %v859_v35 }
 0x1ba   :  { %872 = vrot.lane.b32.xlu0 %v870_v36, %s2295_s13 }
 0x22c   :  { %v873_v38 = vpop.permute.xlu0 %872 }
 0x22d   :  { %v2649_v39 = vadd.f32 %v873_v38, %v865_v37 }
 0x22f   :  { %2144 = vtanh.f32 %v2649_v39 }
 0x235   :  { %v2145_v41 = vpop.eup %2144 }
 0x236   :  { %878 = vrot.lane.b32.xlu1 %v2145_v41, %s2295_s13 }
 0x2a8   :  { %v879_v42 = vpop.permute.xlu1 %878 }
 0x2a9   :  { %v881_v43 = vmul.f32 %v879_v42, %v864_v25 }
 0x2ab   :  { %883 = vst.msk [vmem:[#allocation3] sm:$0x3] %vm882_vm7, %v881_v43  ;;  %2045 = vmatmul.msk.f32.vlgmr.msra.gmra.mxu2 %vm781_vm8, %v881_v43  ;;  %2046 = vmatmul.msk.f32.vlgmr.msra.gmra.mxu3 %vm781_vm8, %v881_v43 }
 0x2ac   :  { %1308 = vmatpush.msra.mxu2 %v2485_v11  ;;  %1328 = vmatpush.msra.mxu3 %v2483_v10 }
 0x2ae   :  { %1309 = vmatpush.msra.mxu2 %v2497_v17  ;;  %1329 = vmatpush.msra.mxu3 %v2495_v16 }
 0x2b0   :  { %1310 = vmatpush.msra.mxu2 %v2503_v1  ;;  %1330 = vmatpush.msra.mxu3 %v2501_v18 }
 0x2b2   :  { %1311 = vmatpush.msra.mxu2 %v2509_v20  ;;  %1331 = vmatpush.msra.mxu3 %v2507_v19 }
 0x2b4   :  { %1312 = vmatpush.msra.mxu2 %v2522_v27  ;;  %1332 = vmatpush.msra.mxu3 %v2520_v26 }
 0x2b6   :  { %1313 = vmatpush.msra.mxu2 %v2530_v29  ;;  %1333 = vmatpush.msra.mxu3 %v2528_v28 }
 0x2b8   :  { %1314 = vmatpush.msra.mxu2 %v2536_v31  ;;  %1334 = vmatpush.msra.mxu3 %v2534_v30 }
 0x2ba   :  { %1315 = vmatpush.msra.mxu2 %v2544_v33  ;;  %1335 = vmatpush.msra.mxu3 %v2542_v32 }
 0x32e   :  { %v925_v44 = vpop.f32.mrf.mxu3  ;;  %v905_v47 = vpop.f32.mrf.mxu2 }
 0x32f   :  { %v930_v46 = vrot.slane %v925_v44, 6 }
 0x331   :  { %v931_v49 = vsel %vm91_vm0, %v905_v47, %v930_v46 }
 0x332   :  { %v933_v50 = vadd.f32 %v931_v49, %v884_v48 }
 0x334   :  { %2146 = vtanh.f32 %v933_v50  ;;  %v2047_v51 = vmul.f32 -1.442695, %v933_v50 }
 0x336   :  { %2148 = vpow2.f32 %v2047_v51 }
 0x33a   :  { %v2147_v52 = vpop.eup %2146 }
 0x33b   :  { %955 = vst [vmem:[#allocation1] ss:$4 sm:$0xff] %v2147_v52 }
 0x33c   :  { %v2149_v53 = vpop.eup %2148 }
 0x33d   :  { %v938_v54 = vadd.f32 1.0, %v2149_v53 }
 0x33f   :  { %2150 = vrcp.f32 %v938_v54  ;;  %v950_v58 = vand.u32 2147483648, %v938_v54  ;;  %v948_v60 = vand.u32 2147483647, %v938_v54  ;;  %vm944_vm10 = vweird.f32 %v938_v54 }
 0x341   :  { %v951_v62 = vor.u32 1.1754944e-38, %v950_v58  ;;  %vm949_vm12 = vcmp.eq.f32.partialorder %v948_v60, 8.507059e+37 }
 0x342   :  { %v957_v3 = vld.sshfl [vmem:[#allocation1 + $0x8] sm:$0xff pattern:$0x73625140] }
 0x345   :  { %v2151_v55 = vpop.eup %2150 }
 0x346   :  { %v940_v56 = vmul.f32 %v2151_v55, %v938_v54  ;;  %vm945_vm9 = vweird.f32 %v2151_v55 }
 0x347   :  { %vm946_vm11 = vmor %vm944_vm10, %vm945_vm9 }
 0x348   :  { %v941_v57 = vsub.f32 1.0, %v940_v56 }
 0x34a   :  { %v942_v59 = vmul.f32 %v2151_v55, %v941_v57 }
 0x34c   :  { %v943_v61 = vadd.f32 %v2151_v55, %v942_v59 }
 0x34e   :  { %v947_v63 = vsel %vm946_vm11, %v2151_v55, %v943_v61 }
 0x34f   :  { %v952_v2 = vsel %vm949_vm12, %v951_v62, %v947_v63 }
 0x350   :  { %961 = vst [vmem:[#allocation1] ss:$4 sm:$0xff] %v952_v2 }
 0x357   :  { %v963_v4 = vld.sshfl [vmem:[#allocation1 + $0x8] sm:$0xff pattern:$0x73625140]  ;;  %v962_v6 = vld.sshfl [vmem:[#allocation1] sm:$0xff pattern:$0x73625140] }
 0x358   :  { %v967_v40 = vsel %vm779_vm6, %v957_v3, %v963_v4  ;;  %v968_v7 = vmul.f32 %v962_v6, %v2649_v39 }
 0x359   :  { %970 = vrot.lane.b32.xlu1 %v967_v40, %s2295_s13 }
 0x3cb   :  { %v971_v5 = vpop.permute.xlu1 %970 }
 0x3cc   :  { %v973_v45 = vmul.f32 %v971_v5, %v962_v6 }
 0x3ce   :  { %975 = vrot.lane.b32.xlu2 %v973_v45, %s2295_s13 }
 0x428   :  { %v976_v8 = vpop.permute.xlu2 %975 }
 0x429   :  { %v978_v9 = vadd.f32 %v976_v8, %v968_v7 }
 0x42b   :  { %2152 = vtanh.f32 %v978_v9 }
 0x431   :  { %v2153_v12 = vpop.eup %2152 }
 0x432   :  { %981 = vrot.lane.b32.xlu2 %v2153_v12, %s2295_s13 }
 0x48c   :  { %v982_v13 = vpop.permute.xlu2 %981 }
 0x48d   :  { %v984_v14 = vmul.f32 %v982_v13, %v967_v40 }
 0x48f   :  { %986 = vst.msk [vmem:[#allocation3 + $0x2] sm:$0x3] %vm882_vm7, %v984_v14  ;;  %2048 = vmatmul.msk.f32.vlgmr.msrb.gmra.mxu0 %vm781_vm8, %v984_v14  ;;  %2049 = vmatmul.msk.f32.vlgmr.msrb.gmra.mxu1 %vm781_vm8, %v984_v14 }
 0x490   :  { %1431 = vmatpush.msrb.mxu1 %v2483_v10  ;;  %1411 = vmatpush.msrb.mxu0 %v2485_v11 }
 0x492   :  { %1432 = vmatpush.msrb.mxu1 %v2495_v16  ;;  %1412 = vmatpush.msrb.mxu0 %v2497_v17 }
 0x494   :  { %1433 = vmatpush.msrb.mxu1 %v2501_v18  ;;  %1413 = vmatpush.msrb.mxu0 %v2503_v1 }
 0x496   :  { %1434 = vmatpush.msrb.mxu1 %v2507_v19  ;;  %1414 = vmatpush.msrb.mxu0 %v2509_v20 }
 0x498   :  { %1435 = vmatpush.msrb.mxu1 %v2520_v26  ;;  %1415 = vmatpush.msrb.mxu0 %v2522_v27 }
 0x49a   :  { %1436 = vmatpush.msrb.mxu1 %v2528_v28  ;;  %1416 = vmatpush.msrb.mxu0 %v2530_v29 }
 0x49c   :  { %1437 = vmatpush.msrb.mxu1 %v2534_v30  ;;  %1417 = vmatpush.msrb.mxu0 %v2536_v31 }
 0x49e   :  { %1438 = vmatpush.msrb.mxu1 %v2542_v32  ;;  %1418 = vmatpush.msrb.mxu0 %v2544_v33 }
 0x50c   :  { %v1028_v0 = vpop.f32.mrf.mxu1  ;;  %v1008_v21 = vpop.f32.mrf.mxu0 }
 0x50d   :  { %v1033_v15 = vrot.slane %v1028_v0, 6 }
 0x50f   :  { %v1034_v24 = vsel %vm91_vm0, %v1008_v21, %v1033_v15 }
 0x510   :  { %v1036_v25 = vadd.f32 %v1034_v24, %v987_v22  ;;  %v1193_v24 = vld [vmem:[#allocation2 + $0x10] sm:$0xf] }
 0x512   :  { %2154 = vtanh.f32 %v1036_v25  ;;  %v2050_v34 = vmul.f32 -1.442695, %v1036_v25 }
 0x514   :  { %2156 = vpow2.f32 %v2050_v34 }
 0x518   :  { %v2155_v35 = vpop.eup %2154 }
 0x519   :  { %1058 = vst [vmem:[#allocation1] ss:$4 sm:$0xff] %v2155_v35 }
 0x51a   :  { %v2157_v36 = vpop.eup %2156 }
 0x51b   :  { %v1041_v37 = vadd.f32 1.0, %v2157_v36 }
 0x51d   :  { %2158 = vrcp.f32 %v1041_v37  ;;  %v1053_v42 = vand.u32 2147483648, %v1041_v37  ;;  %v1051_v44 = vand.u32 2147483647, %v1041_v37  ;;  %vm1047_vm14 = vweird.f32 %v1041_v37 }
 0x51f   :  { %v1054_v47 = vor.u32 1.1754944e-38, %v1053_v42  ;;  %vm1052_vm1 = vcmp.eq.f32.partialorder %v1051_v44, 8.507059e+37 }
 0x520   :  { %v1060_v50 = vld.sshfl [vmem:[#allocation1 + $0x8] sm:$0xff pattern:$0x73625140] }
 0x523   :  { %v2159_v38 = vpop.eup %2158 }
 0x524   :  { %v1043_v39 = vmul.f32 %v2159_v38, %v1041_v37  ;;  %vm1048_vm13 = vweird.f32 %v2159_v38 }
 0x525   :  { %vm1049_vm15 = vmor %vm1047_vm14, %vm1048_vm13 }
 0x526   :  { %v1044_v41 = vsub.f32 1.0, %v1043_v39 }
 0x528   :  { %v1045_v43 = vmul.f32 %v2159_v38, %v1044_v41 }
 0x52a   :  { %v1046_v46 = vadd.f32 %v2159_v38, %v1045_v43 }
 0x52c   :  { %v1050_v48 = vsel %vm1049_vm15, %v2159_v38, %v1046_v46 }
 0x52d   :  { %v1055_v49 = vsel %vm1052_vm1, %v1054_v47, %v1050_v48 }
 0x52e   :  { %1064 = vst [vmem:[#allocation1] ss:$4 sm:$0xff] %v1055_v49 }
 0x535   :  { %v1066_v51 = vld.sshfl [vmem:[#allocation1 + $0x8] sm:$0xff pattern:$0x73625140]  ;;  %v1065_v54 = vld.sshfl [vmem:[#allocation1] sm:$0xff pattern:$0x73625140] }
 0x536   :  { %v1070_v52 = vsel %vm779_vm6, %v1060_v50, %v1066_v51  ;;  %v1071_v56 = vmul.f32 %v1065_v54, %v978_v9 }
 0x537   :  { %1073 = vrot.lane.b32.xlu0 %v1070_v52, %s2295_s13 }
 0x5a9   :  { %v1074_v53 = vpop.permute.xlu0 %1073 }
 0x5aa   :  { %v1076_v55 = vmul.f32 %v1074_v53, %v1065_v54 }
 0x5ac   :  { %1078 = vrot.lane.b32.xlu1 %v1076_v55, %s2295_s13 }
 0x61e   :  { %v1079_v57 = vpop.permute.xlu1 %1078 }
 0x61f   :  { %v1081_v58 = vadd.f32 %v1079_v57, %v1071_v56 }
 0x621   :  { %2160 = vtanh.f32 %v1081_v58 }
 0x627   :  { %v2161_v59 = vpop.eup %2160 }
 0x628   :  { %1084 = vrot.lane.b32.xlu2 %v2161_v59, %s2295_s13 }
 0x682   :  { %v1085_v60 = vpop.permute.xlu2 %1084 }
 0x683   :  { %v1087_v61 = vmul.f32 %v1085_v60, %v1070_v52 }
 0x685   :  { %1089 = vst.msk [vmem:[#allocation3 + $0x4] sm:$0x3] %vm882_vm7, %v1087_v61  ;;  %2051 = vmatmul.msk.f32.vlgmr.msrb.gmra.mxu2 %vm781_vm8, %v1087_v61  ;;  %2052 = vmatmul.msk.f32.vlgmr.msrb.gmra.mxu3 %vm781_vm8, %v1087_v61 }
 0x686   :  { %1534 = vmatpush.msrb.mxu3 %v2483_v10  ;;  %1514 = vmatpush.msrb.mxu2 %v2485_v11 }
 0x688   :  { %1535 = vmatpush.msrb.mxu3 %v2495_v16  ;;  %1515 = vmatpush.msrb.mxu2 %v2497_v17  ;;  %v1090_v17 = vld [vmem:[#allocation2 + $0xc] sm:$0xf] }
 0x68a   :  { %1536 = vmatpush.msrb.mxu3 %v2501_v18  ;;  %1516 = vmatpush.msrb.mxu2 %v2503_v1 }
 0x68c   :  { %1537 = vmatpush.msrb.mxu3 %v2507_v19  ;;  %1517 = vmatpush.msrb.mxu2 %v2509_v20 }
 0x68e   :  { %1538 = vmatpush.msrb.mxu3 %v2520_v26  ;;  %1518 = vmatpush.msrb.mxu2 %v2522_v27 }
 0x690   :  { %1539 = vmatpush.msrb.mxu3 %v2528_v28  ;;  %1519 = vmatpush.msrb.mxu2 %v2530_v29 }
 0x692   :  { %1540 = vmatpush.msrb.mxu3 %v2534_v30  ;;  %1520 = vmatpush.msrb.mxu2 %v2536_v31 }
 0x694   :  { %1541 = vmatpush.msrb.mxu3 %v2542_v32  ;;  %1521 = vmatpush.msrb.mxu2 %v2544_v33 }
 0x708   :  { %v1131_v10 = vpop.f32.mrf.mxu3  ;;  %v1111_v16 = vpop.f32.mrf.mxu2 }
 0x709   :  { %v1136_v11 = vrot.slane %v1131_v10, 6 }
 0x70b   :  { %v1137_v18 = vsel %vm91_vm0, %v1111_v16, %v1136_v11 }
 0x70c   :  { %v1139_v1 = vadd.f32 %v1137_v18, %v1090_v17  ;;  %v1296_v18 = vld [vmem:[#allocation2 + $0x14] sm:$0xf] }
 0x70e   :  { %2162 = vtanh.f32 %v1139_v1  ;;  %v2053_v19 = vmul.f32 -1.442695, %v1139_v1 }
 0x710   :  { %2164 = vpow2.f32 %v2053_v19 }
 0x714   :  { %v2163_v20 = vpop.eup %2162 }
 0x715   :  { %1161 = vst [vmem:[#allocation1] ss:$4 sm:$0xff] %v2163_v20 }
 0x716   :  { %v2165_v26 = vpop.eup %2164 }
 0x717   :  { %v1144_v27 = vadd.f32 1.0, %v2165_v26 }
 0x719   :  { %2166 = vrcp.f32 %v1144_v27  ;;  %v1156_v31 = vand.u32 2147483648, %v1144_v27  ;;  %v1154_v33 = vand.u32 2147483647, %v1144_v27  ;;  %vm1150_vm3 = vweird.f32 %v1144_v27 }
 0x71b   :  { %v1157_v63 = vor.u32 1.1754944e-38, %v1156_v31  ;;  %vm1155_vm5 = vcmp.eq.f32.partialorder %v1154_v33, 8.507059e+37 }
 0x71c   :  { %v1163_v4 = vld.sshfl [vmem:[#allocation1 + $0x8] sm:$0xff pattern:$0x73625140] }
 0x71f   :  { %v2167_v28 = vpop.eup %2166 }
 0x720   :  { %v1146_v29 = vmul.f32 %v2167_v28, %v1144_v27  ;;  %vm1151_vm2 = vweird.f32 %v2167_v28 }
 0x721   :  { %vm1152_vm4 = vmor %vm1150_vm3, %vm1151_vm2 }
 0x722   :  { %v1147_v30 = vsub.f32 1.0, %v1146_v29 }
 0x724   :  { %v1148_v32 = vmul.f32 %v2167_v28, %v1147_v30 }
 0x726   :  { %v1149_v62 = vadd.f32 %v2167_v28, %v1148_v32 }
 0x728   :  { %v1153_v2 = vsel %vm1152_vm4, %v2167_v28, %v1149_v62 }
 0x729   :  { %v1158_v3 = vsel %vm1155_vm5, %v1157_v63, %v1153_v2 }
 0x72a   :  { %1167 = vst [vmem:[#allocation1] ss:$4 sm:$0xff] %v1158_v3 }
 0x731   :  { %v1169_v40 = vld.sshfl [vmem:[#allocation1 + $0x8] sm:$0xff pattern:$0x73625140]  ;;  %v1168_v45 = vld.sshfl [vmem:[#allocation1] sm:$0xff pattern:$0x73625140] }
 0x732   :  { %v1173_v5 = vsel %vm779_vm6, %v1163_v4, %v1169_v40  ;;  %v1174_v8 = vmul.f32 %v1168_v45, %v1081_v58 }
 0x733   :  { %1176 = vrot.lane.b32.xlu0 %v1173_v5, %s2295_s13 }
 0x7a5   :  { %v1177_v6 = vpop.permute.xlu0 %1176 }
 0x7a6   :  { %v1179_v7 = vmul.f32 %v1177_v6, %v1168_v45 }
 0x7a8   :  { %1181 = vrot.lane.b32.xlu1 %v1179_v7, %s2295_s13 }
 0x81a   :  { %v1182_v9 = vpop.permute.xlu1 %1181 }
 0x81b   :  { %v1184_v12 = vadd.f32 %v1182_v9, %v1174_v8  ;;  %v2746_v9 = vld [vmem:[#allocation6 + $0x18] sm:$0xff] }
 0x81d   :  { %2168 = vtanh.f32 %v1184_v12 }
 0x823   :  { %v2169_v13 = vpop.eup %2168 }
 0x824   :  { %1187 = vrot.lane.b32.xlu2 %v2169_v13, %s2295_s13 }
 0x87e   :  { %v1188_v14 = vpop.permute.xlu2 %1187 }
 0x87f   :  { %v1190_v0 = vmul.f32 %v1188_v14, %v1173_v5 }
 0x881   :  { %1192 = vst.msk [vmem:[#allocation3 + $0x6] sm:$0x3] %vm882_vm7, %v1190_v0  ;;  %2054 = vmatmul.msk.f32.vlgmr.msra.gmra.mxu0 %vm781_vm8, %v1190_v0  ;;  %2055 = vmatmul.msk.f32.vlgmr.msra.gmra.mxu1 %vm781_vm8, %v1190_v0 }
 0x882   :  { %1697 = vmatpush.bf16.msra.mxu1 %v2746_v9 }
 0x8fe   :  { %v1234_v15 = vpop.f32.mrf.mxu1  ;;  %v1214_v22 = vpop.f32.mrf.mxu0 }
 0x8ff   :  { %v1239_v21 = vrot.slane %v1234_v15, 6 }
 0x901   :  { %v1240_v25 = vsel %vm91_vm0, %v1214_v22, %v1239_v21  ;;  %v2758_v21 = vld [vmem:[#allocation6 + $0x8] sm:$0xff]  ;;  %v2761_v22 = vld [vmem:[#allocation6] sm:$0xff] }
 0x902   :  { %v1242_v34 = vadd.f32 %v1240_v25, %v1193_v24 }
 0x904   :  { %2170 = vtanh.f32 %v1242_v34  ;;  %v2056_v35 = vmul.f32 -1.442695, %v1242_v34  ;;  %v1622_v34 = vld [vmem:[#allocation3] sm:$0x3] }
 0x906   :  { %2172 = vpow2.f32 %v2056_v35  ;;  %v1623_v35 = vpack.c.bf16 %v1622_v34, %v1622_v34  ;;  %v1874_v34 = vld [vmem:[#allocation3 + $0x4] sm:$0x3] }
 0x90a   :  { %v2171_v36 = vpop.eup %2170 }
 0x90b   :  { %1264 = vst [vmem:[#allocation1] ss:$4 sm:$0xff] %v2171_v36  ;;  %v1752_v36 = vld [vmem:[#allocation3 + $0x4] sm:$0x3] }
 0x90c   :  { %v2173_v37 = vpop.eup %2172 }
 0x90d   :  { %v1247_v38 = vadd.f32 1.0, %v2173_v37  ;;  %v1753_v37 = vpack.c.bf16 %v1752_v36, %v1752_v36  ;;  %v1875_v36 = vpack.c.bf16 %v1874_v34, %v1874_v34 }
 0x90f   :  { %2174 = vrcp.f32 %v1247_v38  ;;  %v1259_v43 = vand.u32 2147483648, %v1247_v38  ;;  %v1257_v46 = vand.u32 2147483647, %v1247_v38  ;;  %vm1253_vm10 = vweird.f32 %v1247_v38 }
 0x911   :  { %v1260_v48 = vor.u32 1.1754944e-38, %v1259_v43  ;;  %vm1258_vm12 = vcmp.eq.f32.partialorder %v1257_v46, 8.507059e+37 }
 0x912   :  { %v1266_v51 = vld.sshfl [vmem:[#allocation1 + $0x8] sm:$0xff pattern:$0x73625140] }
 0x915   :  { %v2175_v39 = vpop.eup %2174 }
 0x916   :  { %v1249_v41 = vmul.f32 %v2175_v39, %v1247_v38  ;;  %vm1254_vm9 = vweird.f32 %v2175_v39 }
 0x917   :  { %vm1255_vm11 = vmor %vm1253_vm10, %vm1254_vm9 }
 0x918   :  { %v1250_v42 = vsub.f32 1.0, %v1249_v41 }
 0x91a   :  { %v1251_v44 = vmul.f32 %v2175_v39, %v1250_v42 }
 0x91c   :  { %v1252_v47 = vadd.f32 %v2175_v39, %v1251_v44  ;;  %v1399_v44 = vld [vmem:[#allocation2 + $0x18] sm:$0xf] }
 0x91e   :  { %v1256_v49 = vsel %vm1255_vm11, %v2175_v39, %v1252_v47 }
 0x91f   :  { %v1261_v50 = vsel %vm1258_vm12, %v1260_v48, %v1256_v49 }
 0x920   :  { %1270 = vst [vmem:[#allocation1] ss:$4 sm:$0xff] %v1261_v50 }
 0x927   :  { %v1272_v52 = vld.sshfl [vmem:[#allocation1 + $0x8] sm:$0xff pattern:$0x73625140]  ;;  %v1271_v55 = vld.sshfl [vmem:[#allocation1] sm:$0xff pattern:$0x73625140] }
 0x928   :  { %v1276_v53 = vsel %vm779_vm6, %v1266_v51, %v1272_v52  ;;  %v1277_v57 = vmul.f32 %v1271_v55, %v1184_v12  ;;  %v2749_v12 = vld [vmem:[#allocation6 + $0x10] sm:$0xff] }
 0x929   :  { %1279 = vrot.lane.b32.xlu0 %v1276_v53, %s2295_s13  ;;  %1698 = vmatpush.bf16.msra.mxu1 %v2749_v12 }
 0x92d   :  { %1699 = vmatpush.bf16.msra.mxu1 %v2758_v21 }
 0x931   :  { %1700 = vmatpush.bf16.msra.mxu1 %v2761_v22 }
 0x99b   :  { %v1280_v54 = vpop.permute.xlu0 %1279 }
 0x99c   :  { %v1282_v56 = vmul.f32 %v1280_v54, %v1271_v55 }
 0x99e   :  { %1284 = vrot.lane.b32.xlu1 %v1282_v56, %s2295_s13 }
 0xa10   :  { %v1285_v58 = vpop.permute.xlu1 %1284 }
 0xa11   :  { %v1287_v59 = vadd.f32 %v1285_v58, %v1277_v57 }
 0xa13   :  { %2176 = vtanh.f32 %v1287_v59 }
 0xa19   :  { %v2177_v60 = vpop.eup %2176 }
 0xa1a   :  { %1290 = vrot.lane.b32.xlu2 %v2177_v60, %s2295_s13 }
 0xa74   :  { %v1291_v61 = vpop.permute.xlu2 %1290 }
 0xa75   :  { %v1293_v10 = vmul.f32 %v1291_v61, %v1276_v53 }
 0xa77   :  { %1295 = vst.msk [vmem:[#allocation3 + $0x8] sm:$0x3] %vm882_vm7, %v1293_v10  ;;  %2057 = vmatmul.msk.f32.vlgmr.msra.gmra.mxu2 %vm781_vm8, %v1293_v10  ;;  %2058 = vmatmul.msk.f32.vlgmr.msra.gmra.mxu3 %vm781_vm8, %v1293_v10 }
 0xa78   :  { %1739 = vmatpush.bf16.msra.mxu3 %v2746_v9 }
 0xa7c   :  { %1740 = vmatpush.bf16.msra.mxu3 %v2749_v12 }
 0xa7e   :  { %v1832_v38 = vld [vmem:[#allocation3 + $0x8] sm:$0x3] }
 0xa7f   :  { %v1833_v39 = vpack.c.bf16 %v1832_v38, %v1832_v38 }
 0xa80   :  { %1741 = vmatpush.bf16.msra.mxu3 %v2758_v21 }
 0xa84   :  { %1742 = vmatpush.bf16.msra.mxu3 %v2761_v22 }
 0xafa   :  { %v1337_v11 = vpop.f32.mrf.mxu3  ;;  %v1317_v17 = vpop.f32.mrf.mxu2 }
 0xafb   :  { %v1342_v16 = vrot.slane %v1337_v11, 6 }
 0xafd   :  { %v1343_v1 = vsel %vm91_vm0, %v1317_v17, %v1342_v16 }
 0xafe   :  { %v1345_v19 = vadd.f32 %v1343_v1, %v1296_v18 }
 0xb00   :  { %2178 = vtanh.f32 %v1345_v19  ;;  %v2059_v20 = vmul.f32 -1.442695, %v1345_v19 }
 0xb02   :  { %2180 = vpow2.f32 %v2059_v20 }
 0xb06   :  { %v2179_v26 = vpop.eup %2178 }
 0xb07   :  { %1367 = vst [vmem:[#allocation1] ss:$4 sm:$0xff] %v2179_v26 }
 0xb08   :  { %v2181_v27 = vpop.eup %2180 }
 0xb09   :  { %v1350_v28 = vadd.f32 1.0, %v2181_v27 }
 0xb0b   :  { %2182 = vrcp.f32 %v1350_v28  ;;  %v1362_v32 = vand.u32 2147483648, %v1350_v28  ;;  %v1360_v62 = vand.u32 2147483647, %v1350_v28  ;;  %vm1356_vm14 = vweird.f32 %v1350_v28 }
 0xb0d   :  { %v1363_v2 = vor.u32 1.1754944e-38, %v1362_v32  ;;  %vm1361_vm1 = vcmp.eq.f32.partialorder %v1360_v62, 8.507059e+37 }
 0xb0e   :  { %v1369_v40 = vld.sshfl [vmem:[#allocation1 + $0x8] sm:$0xff pattern:$0x73625140] }
 0xb11   :  { %v2183_v29 = vpop.eup %2182 }
 0xb12   :  { %v1352_v30 = vmul.f32 %v2183_v29, %v1350_v28  ;;  %vm1357_vm13 = vweird.f32 %v2183_v29 }
 0xb13   :  { %vm1358_vm15 = vmor %vm1356_vm14, %vm1357_vm13 }
 0xb14   :  { %v1353_v31 = vsub.f32 1.0, %v1352_v30  ;;  %v2795_v30 = vld [vmem:[#allocation8 + $0x18] sm:$0xff] }
 0xb15   :  { %1723 = vmatpush.bf16.msra.mxu2 %v2795_v30  ;;  %1657 = vmatpush.bf16.msra.mxu0 %v2795_v30 }
 0xb16   :  { %v1354_v33 = vmul.f32 %v2183_v29, %v1353_v31 }
 0xb18   :  { %v1355_v63 = vadd.f32 %v2183_v29, %v1354_v33 }
 0xb1a   :  { %v1359_v3 = vsel %vm1358_vm15, %v2183_v29, %v1355_v63  ;;  %v2804_v63 = vld [vmem:[#allocation8 + $0x10] sm:$0xff] }
 0xb1b   :  { %v1364_v4 = vsel %vm1361_vm1, %v1363_v2, %v1359_v3  ;;  %1724 = vmatpush.bf16.msra.mxu2 %v2804_v63  ;;  %1658 = vmatpush.bf16.msra.mxu0 %v2804_v63  ;;  %v2808_v2 = vld [vmem:[#allocation8 + $0x8] sm:$0xff]  ;;  %v2811_v3 = vld [vmem:[#allocation8] sm:$0xff] }
 0xb1c   :  { %1373 = vst [vmem:[#allocation1] ss:$4 sm:$0xff] %v1364_v4 }
 0xb1f   :  { %1725 = vmatpush.bf16.msra.mxu2 %v2808_v2  ;;  %1659 = vmatpush.bf16.msra.mxu0 %v2808_v2 }
 0xb23   :  { %v1375_v5 = vld.sshfl [vmem:[#allocation1 + $0x8] sm:$0xff pattern:$0x73625140]  ;;  %v1374_v7 = vld.sshfl [vmem:[#allocation1] sm:$0xff pattern:$0x73625140]  ;;  %1726 = vmatpush.bf16.msra.mxu2 %v2811_v3  ;;  %1660 = vmatpush.bf16.msra.mxu0 %v2811_v3 }
 0xb24   :  { %v1379_v6 = vsel %vm779_vm6, %v1369_v40, %v1375_v5  ;;  %v1380_v13 = vmul.f32 %v1374_v7, %v1287_v59  ;;  %v1712_v5 = vld [vmem:[#allocation3 + $0x2] sm:$0x3] }
 0xb25   :  { %1382 = vrot.lane.b32.xlu0 %v1379_v6, %s2295_s13 }
 0xb97   :  { %v1383_v45 = vpop.permute.xlu0 %1382 }
 0xb98   :  { %v1385_v8 = vmul.f32 %v1383_v45, %v1374_v7 }
 0xb9a   :  { %1387 = vrot.lane.b32.xlu1 %v1385_v8, %s2295_s13 }
 0xc0c   :  { %v1388_v14 = vpop.permute.xlu1 %1387 }
 0xc0d   :  { %v2754_v0 = vadd.f32 %v1388_v14, %v1380_v13  ;;  %v1792_v14 = vld [vmem:[#allocation3 + $0x6] sm:$0x3] }
 0xc0f   :  { %2184 = vtanh.f32 %v2754_v0 }
 0xc15   :  { %v2185_v15 = vpop.eup %2184 }
 0xc16   :  { %1393 = vrot.lane.b32.xlu2 %v2185_v15, %s2295_s13  ;;  %v1793_v15 = vpack.c.bf16 %v1792_v14, %v1792_v14 }
 0xc70   :  { %v1394_v24 = vpop.permute.xlu2 %1393 }
 0xc71   :  { %v1396_v25 = vmul.f32 %v1394_v24, %v1379_v6  ;;  %v1713_v6 = vpack.c.bf16 %v1712_v5, %v1712_v5 }
 0xc73   :  { %1398 = vst.msk [vmem:[#allocation3 + $0xa] sm:$0x3] %vm882_vm7, %v1396_v25  ;;  %2060 = vmatmul.msk.f32.vlgmr.msrb.gmra.mxu0 %vm781_vm8, %v1396_v25  ;;  %2061 = vmatmul.msk.f32.vlgmr.msrb.gmra.mxu1 %vm781_vm8, %v1396_v25 }
 0xc74   :  { %1779 = vmatpush.bf16.msrb.mxu1 %v2746_v9  ;;  %1763 = vmatpush.bf16.msrb.mxu0 %v2795_v30 }
 0xc78   :  { %1780 = vmatpush.bf16.msrb.mxu1 %v2749_v12  ;;  %1764 = vmatpush.bf16.msrb.mxu0 %v2804_v63 }
 0xc7a   :  { %v1872_v25 = vld [vmem:[#allocation3 + $0xa] sm:$0x3] }
 0xc7b   :  { %2099 = vmatmul.msk.bf16.vlgmr.msra.gmra.mxu1 %vm781_vm8, %v1623_v35  ;;  %v1873_v35 = vpack.c.bf16 %v1872_v25, %v1872_v25 }
 0xc7c   :  { %1781 = vmatpush.bf16.msrb.mxu1 %v2758_v21  ;;  %1765 = vmatpush.bf16.msrb.mxu0 %v2808_v2 }
 0xc80   :  { %1782 = vmatpush.bf16.msrb.mxu1 %v2761_v22  ;;  %1766 = vmatpush.bf16.msrb.mxu0 %v2811_v3 }
 0xc84   :  { %1859 = vmatpush.bf16.msra.mxu1 %v2746_v9 }
 0xc88   :  { %1860 = vmatpush.bf16.msra.mxu1 %v2749_v12 }
 0xc8b   :  { %2104 = vmatmul.msk.bf16.vlgmr.msrb.gmra.mxu1 %vm781_vm8, %v1753_v37 }
 0xc8c   :  { %1861 = vmatpush.bf16.msra.mxu1 %v2758_v21 }
 0xc90   :  { %1862 = vmatpush.bf16.msra.mxu1 %v2761_v22 }
 0xc94   :  { %1939 = vmatpush.bf16.msrb.mxu1 %v2746_v9 }
 0xc98   :  { %1940 = vmatpush.bf16.msrb.mxu1 %v2749_v12 }
 0xc9b   :  { %2110 = vmatmul.msk.bf16.vlgmr.msra.gmra.mxu1 %vm781_vm8, %v1833_v39  ;;  %v1502_v39 = vld [vmem:[#allocation2 + $0x1c] sm:$0xf] }
 0xc9c   :  { %1941 = vmatpush.bf16.msrb.mxu1 %v2758_v21 }
 0xca0   :  { %1942 = vmatpush.bf16.msrb.mxu1 %v2761_v22 }
 0xcf0   :  { %v1440_v41 = vpop.f32.mrf.mxu1  ;;  %v1420_v43 = vpop.f32.mrf.mxu0 }
 0xcf1   :  { %v1445_v42 = vrot.slane %v1440_v41, 6 }
 0xcf3   :  { %v1446_v46 = vsel %vm91_vm0, %v1420_v43, %v1445_v42 }
 0xcf4   :  { %v1448_v47 = vadd.f32 %v1446_v46, %v1399_v44  ;;  %v2861_v46 = vld [vmem:[%s2926_s7] ss:$0 sm:$0xff] }
 0xcf6   :  { %2186 = vtanh.f32 %v1448_v47  ;;  %v2062_v48 = vmul.f32 -1.442695, %v1448_v47 }
 0xcf8   :  { %2188 = vpow2.f32 %v2062_v48  ;;  %v2785_v49 = vpop.f32.mrf.mxu1 }
 0xcfc   :  { %v2187_v50 = vpop.eup %2186 }
 0xcfd   :  { %1470 = vst [vmem:[#allocation1] ss:$4 sm:$0xff] %v2187_v50 }
 0xcfe   :  { %v2189_v51 = vpop.eup %2188 }
 0xcff   :  { %v1453_v52 = vadd.f32 1.0, %v2189_v51 }
 0xd00   :  { %v1704_v53 = vpop.f32.mrf.mxu1 }
 0xd01   :  { %2190 = vrcp.f32 %v1453_v52  ;;  %v1465_v58 = vand.u32 2147483648, %v1453_v52  ;;  %v1463_v60 = vand.u32 2147483647, %v1453_v52  ;;  %vm1459_vm3 = vweird.f32 %v1453_v52 }
 0xd03   :  { %v1466_v10 = vor.u32 1.1754944e-38, %v1465_v58  ;;  %vm1464_vm5 = vcmp.eq.f32.partialorder %v1463_v60, 8.507059e+37 }
 0xd04   :  { %v1472_v18 = vld.sshfl [vmem:[#allocation1 + $0x8] sm:$0xff pattern:$0x73625140] }
 0xd07   :  { %v2191_v54 = vpop.eup %2190 }
 0xd08   :  { %v1455_v55 = vmul.f32 %v2191_v54, %v1453_v52  ;;  %v2787_v56 = vpop.f32.mrf.mxu1  ;;  %vm1460_vm2 = vweird.f32 %v2191_v54 }
 0xd09   :  { %vm1461_vm4 = vmor %vm1459_vm3, %vm1460_vm2 }
 0xd0a   :  { %v1456_v57 = vsub.f32 1.0, %v1455_v55 }
 0xd0c   :  { %v1457_v59 = vmul.f32 %v2191_v54, %v1456_v57 }
 0xd0e   :  { %v1458_v61 = vadd.f32 %v2191_v54, %v1457_v59 }
 0xd10   :  { %v1462_v11 = vsel %vm1461_vm4, %v2191_v54, %v1458_v61  ;;  %v1786_v16 = vpop.f32.mrf.mxu1 }
 0xd11   :  { %v1467_v17 = vsel %vm1464_vm5, %v1466_v10, %v1462_v11 }
 0xd12   :  { %1476 = vst [vmem:[#allocation1] ss:$4 sm:$0xff] %v1467_v17 }
 0xd18   :  { %v2789_v1 = vpop.f32.mrf.mxu1 }
 0xd19   :  { %v1478_v19 = vld.sshfl [vmem:[#allocation1 + $0x8] sm:$0xff pattern:$0x73625140]  ;;  %v1477_v28 = vld.sshfl [vmem:[#allocation1] sm:$0xff pattern:$0x73625140] }
 0xd1a   :  { %v1482_v20 = vsel %vm779_vm6, %v1472_v18, %v1478_v19  ;;  %v1483_v31 = vmul.f32 %v1477_v28, %v2754_v0  ;;  %v1794_v0 = vld [vmem:[#allocation3 + $0x8] sm:$0x3] }
 0xd1b   :  { %1485 = vrot.lane.b32.xlu0 %v1482_v20, %s2295_s13  ;;  %v1795_v24 = vpack.c.bf16 %v1794_v0, %v1794_v0 }
 0xd20   :  { %v1866_v26 = vpop.f32.mrf.mxu1 }
 0xd8d   :  { %v1486_v27 = vpop.permute.xlu0 %1485 }
 0xd8e   :  { %v1488_v29 = vmul.f32 %v1486_v27, %v1477_v28 }
 0xd90   :  { %1490 = vrot.lane.b32.xlu1 %v1488_v29, %s2295_s13 }
 0xe02   :  { %v1491_v32 = vpop.permute.xlu1 %1490 }
 0xe03   :  { %v2800_v33 = vadd.f32 %v1491_v32, %v1483_v31 }
 0xe05   :  { %2192 = vtanh.f32 %v2800_v33 }
 0xe0b   :  { %v2193_v62 = vpop.eup %2192 }
 0xe0c   :  { %1496 = vrot.lane.b32.xlu2 %v2193_v62, %s2295_s13 }
 0xe66   :  { %v1497_v4 = vpop.permute.xlu2 %1496 }
 0xe67   :  { %v1499_v40 = vmul.f32 %v1497_v4, %v1482_v20 }
 0xe69   :  { %1501 = vst.msk [vmem:[#allocation3 + $0xc] sm:$0x3] %vm882_vm7, %v1499_v40  ;;  %2063 = vmatmul.msk.f32.vlgmr.msrb.gmra.mxu2 %vm781_vm8, %v1499_v40  ;;  %2064 = vmatmul.msk.f32.vlgmr.msrb.gmra.mxu3 %vm781_vm8, %v1499_v40 }
 0xe6a   :  { %1819 = vmatpush.bf16.msrb.mxu3 %v2746_v9  ;;  %1803 = vmatpush.bf16.msrb.mxu2 %v2795_v30 }
 0xe6e   :  { %1820 = vmatpush.bf16.msrb.mxu3 %v2749_v12  ;;  %1804 = vmatpush.bf16.msrb.mxu2 %v2804_v63 }
 0xe70   :  { %v1714_v45 = vld [vmem:[#allocation3 + $0xc] sm:$0x3] }
 0xe71   :  { %v1912_v7 = vld [vmem:[#allocation3 + $0xc] sm:$0x3]  ;;  %2101 = vmatmul.msk.bf16.vlgmr.msra.gmra.mxu3 %vm781_vm8, %v1713_v6  ;;  %v1715_v8 = vpack.c.bf16 %v1714_v45, %v1714_v45 }
 0xe72   :  { %v1913_v13 = vpack.c.bf16 %v1912_v7, %v1912_v7  ;;  %1821 = vmatpush.bf16.msrb.mxu3 %v2758_v21  ;;  %1805 = vmatpush.bf16.msrb.mxu2 %v2808_v2 }
 0xe73   :  { %2100 = vmatmul.msk.bf16.vlgmr.msra.gmra.mxu2 %vm781_vm8, %v1715_v8 }
 0xe74   :  { %2116 = vmatmul.msk.bf16.vlgmr.msrb.gmra.mxu1 %vm781_vm8, %v1913_v13 }
 0xe76   :  { %1822 = vmatpush.bf16.msrb.mxu3 %v2761_v22  ;;  %1806 = vmatpush.bf16.msrb.mxu2 %v2811_v3 }
 0xe7a   :  { %1899 = vmatpush.bf16.msra.mxu3 %v2746_v9  ;;  %1883 = vmatpush.bf16.msra.mxu2 %v2795_v30 }
 0xe7e   :  { %1900 = vmatpush.bf16.msra.mxu3 %v2749_v12  ;;  %1884 = vmatpush.bf16.msra.mxu2 %v2804_v63 }
 0xe81   :  { %2107 = vmatmul.msk.bf16.vlgmr.msrb.gmra.mxu3 %vm781_vm8, %v1793_v15 }
 0xe82   :  { %1901 = vmatpush.bf16.msra.mxu3 %v2758_v21  ;;  %1885 = vmatpush.bf16.msra.mxu2 %v2808_v2 }
 0xe83   :  { %2106 = vmatmul.msk.bf16.vlgmr.msrb.gmra.mxu2 %vm781_vm8, %v1795_v24 }
 0xe86   :  { %1902 = vmatpush.bf16.msra.mxu3 %v2761_v22  ;;  %1886 = vmatpush.bf16.msra.mxu2 %v2811_v3 }
 0xe8a   :  { %1979 = vmatpush.bf16.msrb.mxu3 %v2746_v9  ;;  %1963 = vmatpush.bf16.msrb.mxu2 %v2795_v30  ;;  %v1954_v9 = vld [vmem:[#allocation3] sm:$0x3] }
 0xe8e   :  { %1980 = vmatpush.bf16.msrb.mxu3 %v2749_v12  ;;  %1964 = vmatpush.bf16.msrb.mxu2 %v2804_v63  ;;  %v1955_v12 = vpack.c.bf16 %v1954_v9, %v1954_v9 }
 0xe91   :  { %2113 = vmatmul.msk.bf16.vlgmr.msra.gmra.mxu3 %vm781_vm8, %v1873_v35 }
 0xe92   :  { %1981 = vmatpush.bf16.msrb.mxu3 %v2758_v21  ;;  %1965 = vmatpush.bf16.msrb.mxu2 %v2808_v2 }
 0xe93   :  { %2112 = vmatmul.msk.bf16.vlgmr.msra.gmra.mxu2 %vm781_vm8, %v1875_v36 }
 0xe96   :  { %1982 = vmatpush.bf16.msrb.mxu3 %v2761_v22  ;;  %1966 = vmatpush.bf16.msrb.mxu2 %v2811_v3 }
 0xea3   :  { %2118 = vmatmul.msk.bf16.vlgmr.msrb.gmra.mxu2 %vm781_vm8, %v1955_v12 }
 0xeec   :  { %v1543_v37 = vpop.f32.mrf.mxu3  ;;  %v1523_v21 = vpop.f32.mrf.mxu2 }
 0xeed   :  { %v1548_v38 = vrot.slane %v1543_v37, 6 }
 0xeef   :  { %v1549_v41 = vsel %vm91_vm0, %v1523_v21, %v1548_v38 }
 0xef0   :  { %v1551_v42 = vadd.f32 %v1549_v41, %v1502_v39 }
 0xef1   :  { %v2856_v43 = vpop.f32.mrf.mxu1 }
 0xef2   :  { %2194 = vtanh.f32 %v1551_v42  ;;  %v2065_v22 = vmul.f32 -1.442695, %v1551_v42 }
 0xef4   :  { %2196 = vpow2.f32 %v2065_v22  ;;  %v1744_v44 = vpop.f32.mrf.mxu3 }
 0xef6   :  { %v1728_v47 = vpop.f32.mrf.mxu2 }
 0xef7   :  { %v1745_v48 = vadd.f32 %v1744_v44, %v1728_v47  ;;  %v1834_v44 = vld [vmem:[#allocation3 + $0x6] sm:$0x3] }
 0xef8   :  { %v2195_v50 = vpop.eup %2194  ;;  %v1835_v47 = vpack.c.bf16 %v1834_v44, %v1834_v44 }
 0xef9   :  { %v1946_v51 = vpop.f32.mrf.mxu1  ;;  %1573 = vst [vmem:[#allocation1] ss:$4 sm:$0xff] %v2195_v50  ;;  %v1748_v52 = vadd.f32 %v2861_v46, %v1745_v48  ;;  %v1914_v48 = vld [vmem:[#allocation3 + $0x2] sm:$0x3] }
 0xefa   :  { %v2197_v53 = vpop.eup %2196  ;;  %v1915_v50 = vpack.c.bf16 %v1914_v48, %v1914_v48 }
 0xefb   :  { %v1556_v54 = vadd.f32 1.0, %v2197_v53  ;;  %2198 = vtanh.f32 %v1748_v52 }
 0xefc   :  { %v1746_v55 = vpop.f32.mrf.mxu3 }
 0xefd   :  { %2200 = vrcp.f32 %v1556_v54  ;;  %v1568_v16 = vand.u32 2147483648, %v1556_v54  ;;  %v1566_v19 = vand.u32 2147483647, %v1556_v54  ;;  %vm1562_vm9 = vweird.f32 %v1556_v54 }
 0xefe   :  { %v1730_v57 = vpop.f32.mrf.mxu2 }
 0xeff   :  { %v1569_v27 = vor.u32 1.1754944e-38, %v1568_v16  ;;  %vm1567_vm11 = vcmp.eq.f32.partialorder %v1566_v19, 8.507059e+37 }
 0xf00   :  { %v1575_v32 = vld.sshfl [vmem:[#allocation1 + $0x8] sm:$0xff pattern:$0x73625140] }
 0xf01   :  { %v2199_v58 = vpop.eup %2198 }
 0xf02   :  { %2102 = vst [vmem:[%s2927_s8 + $0x2] sm:$0x3] %v2199_v58 }
 0xf03   :  { %v2201_v59 = vpop.eup %2200 }
 0xf04   :  { %v1558_v60 = vmul.f32 %v2201_v59, %v1556_v54  ;;  %v1824_v61 = vpop.f32.mrf.mxu3  ;;  %vm1563_vm0 = vweird.f32 %v2201_v59 }
 0xf05   :  { %vm1564_vm10 = vmor %vm1562_vm9, %vm1563_vm0 }
 0xf06   :  { %v1559_v10 = vsub.f32 1.0, %v1558_v60  ;;  %v1808_v11 = vpop.f32.mrf.mxu2 }
 0xf07   :  { %v1825_v17 = vadd.f32 %v1824_v61, %v1808_v11 }
 0xf08   :  { %v1560_v18 = vmul.f32 %v2201_v59, %v1559_v10 }
 0xf09   :  { %v1828_v20 = vadd.f32 %v2861_v46, %v1825_v17 }
 0xf0a   :  { %v1561_v26 = vadd.f32 %v2201_v59, %v1560_v18 }
 0xf0b   :  { %2202 = vtanh.f32 %v1828_v20 }
 0xf0c   :  { %v1565_v28 = vsel %vm1564_vm10, %v2201_v59, %v1561_v26  ;;  %v1826_v29 = vpop.f32.mrf.mxu3 }
 0xf0d   :  { %v1570_v31 = vsel %vm1567_vm11, %v1569_v27, %v1565_v28 }
 0xf0e   :  { %v1810_v62 = vpop.f32.mrf.mxu2  ;;  %1579 = vst [vmem:[#allocation1] ss:$4 sm:$0xff] %v1570_v31 }
 0xf11   :  { %v2203_v4 = vpop.eup %2202 }
 0xf12   :  { %2108 = vst [vmem:[%s2927_s8 + $0x6] sm:$0x3] %v2203_v4 }
 0xf14   :  { %v1904_v40 = vpop.f32.mrf.mxu3 }
 0xf15   :  { %v1581_v5 = vld.sshfl [vmem:[#allocation1 + $0x8] sm:$0xff pattern:$0x73625140]  ;;  %v1580_v34 = vld.sshfl [vmem:[#allocation1] sm:$0xff pattern:$0x73625140] }
 0xf16   :  { %v1888_v6 = vpop.f32.mrf.mxu2  ;;  %v1585_v45 = vsel %vm779_vm6, %v1575_v32, %v1581_v5  ;;  %v1586_v23 = vmul.f32 %v1580_v34, %v2800_v33  ;;  %v1754_v33 = vld [vmem:[#allocation3 + $0xa] sm:$0x3] }
 0xf17   :  { %v1905_v7 = vadd.f32 %v1904_v40, %v1888_v6  ;;  %1588 = vrot.lane.b32.xlu0 %v1585_v45, %s2295_s13  ;;  %v1755_v22 = vpack.c.bf16 %v1754_v33, %v1754_v33 }
 0xf19   :  { %v1908_v8 = vadd.f32 %v2861_v46, %v1905_v7 }
 0xf1b   :  { %2204 = vtanh.f32 %v1908_v8 }
 0xf1c   :  { %v1906_v13 = vpop.f32.mrf.mxu3 }
 0xf1e   :  { %v1890_v14 = vpop.f32.mrf.mxu2 }
 0xf21   :  { %v2205_v0 = vpop.eup %2204 }
 0xf22   :  { %2114 = vst [vmem:[%s2927_s8 + $0xa] sm:$0x3] %v2205_v0 }
 0xf26   :  { %v1968_v15 = vpop.f32.mrf.mxu2 }
 0xf2e   :  { %v1970_v24 = vpop.f32.mrf.mxu2 }
 0xf89   :  { %v1589_v25 = vpop.permute.xlu0 %1588 }
 0xf8a   :  { %v1591_v35 = vmul.f32 %v1589_v25, %v1580_v34 }
 0xf8c   :  { %1593 = vrot.lane.b32.xlu1 %v1591_v35, %s2295_s13 }
 0xffe   :  { %v1594_v36 = vpop.permute.xlu1 %1593 }
 0xfff   :  { %v1596_v9 = vadd.f32 %v1594_v36, %v1586_v23 }
0x1001   :  { %2206 = vtanh.f32 %v1596_v9 }
0x1007   :  { %v2207_v12 = vpop.eup %2206 }
0x1008   :  { %1599 = vrot.lane.b32.xlu2 %v2207_v12, %s2295_s13 }
0x1062   :  { %v1600_v37 = vpop.permute.xlu2 %1599 }
0x1063   :  { %v1602_v38 = vmul.f32 %v1600_v37, %v1585_v45 }
0x1065   :  { %1604 = vst.msk [vmem:[#allocation3 + $0xe] sm:$0x3] %vm882_vm7, %v1602_v38 }
0x106c   :  { %v1624_v21 = vld [vmem:[#allocation3 + $0xe] sm:$0x3] }
0x106d   :  { %v1952_v39 = vld [vmem:[#allocation3 + $0xe] sm:$0x3]  ;;  %v1625_v41 = vpack.c.bf16 %v1624_v21, %v1624_v21 }
0x106e   :  { %v1953_v42 = vpack.c.bf16 %v1952_v39, %v1952_v39 }
0x106f   :  { %2082 = vmatmul.msk.bf16.vlgmr.msra.gmra.mxu0 %vm781_vm8, %v1625_v41 }
0x1070   :  { %2119 = vmatmul.msk.bf16.vlgmr.msrb.gmra.mxu3 %vm781_vm8, %v1953_v42  ;;  %1843 = vmatpush.bf16.msra.mxu0 %v2795_v30 }
0x1074   :  { %1844 = vmatpush.bf16.msra.mxu0 %v2804_v63 }
0x1078   :  { %1845 = vmatpush.bf16.msra.mxu0 %v2808_v2 }
0x107c   :  { %1846 = vmatpush.bf16.msra.mxu0 %v2811_v3 }
0x107f   :  { %2103 = vmatmul.msk.bf16.vlgmr.msrb.gmra.mxu0 %vm781_vm8, %v1755_v22 }
0x1080   :  { %1923 = vmatpush.bf16.msrb.mxu0 %v2795_v30 }
0x1084   :  { %1924 = vmatpush.bf16.msrb.mxu0 %v2804_v63 }
0x1088   :  { %1925 = vmatpush.bf16.msrb.mxu0 %v2808_v2 }
0x108c   :  { %1926 = vmatpush.bf16.msrb.mxu0 %v2811_v3 }
0x108f   :  { %2109 = vmatmul.msk.bf16.vlgmr.msra.gmra.mxu0 %vm781_vm8, %v1835_v47 }
0x109f   :  { %2115 = vmatmul.msk.bf16.vlgmr.msrb.gmra.mxu0 %vm781_vm8, %v1915_v50 }
0x10ec   :  { %v1662_v51 = vpop.f32.mrf.mxu0 }
0x10ed   :  { %v1703_v52 = vadd.f32 %v2785_v49, %v1662_v51 }
0x10ef   :  { %v1709_v53 = vadd.f32 %v2861_v46, %v1703_v52 }
0x10f1   :  { %2208 = vtanh.f32 %v1709_v53 }
0x10f3   :  { %v1984_v30 = vpop.f32.mrf.mxu3 }
0x10f4   :  { %v1985_v63 = vadd.f32 %v1984_v30, %v1968_v15  ;;  %v1664_v54 = vpop.f32.mrf.mxu0 }
0x10f6   :  { %v1988_v2 = vadd.f32 %v2861_v46, %v1985_v63 }
0x10f7   :  { %v2209_v55 = vpop.eup %2208 }
0x10f8   :  { %2210 = vtanh.f32 %v1988_v2  ;;  %1711 = vst [vmem:[%s2927_s8] sm:$0x3] %v2209_v55 }
0x10fb   :  { %v1986_v3 = vpop.f32.mrf.mxu3 }
0x10fc   :  { %v1768_v57 = vpop.f32.mrf.mxu0 }
0x10fd   :  { %v1785_v59 = vadd.f32 %v2787_v56, %v1768_v57 }
0x10fe   :  { %v2211_v58 = vpop.eup %2210 }
0x10ff   :  { %2120 = vst [vmem:[%s2927_s8 + $0xe] sm:$0x3] %v2211_v58  ;;  %v1788_v49 = vadd.f32 %v2861_v46, %v1785_v59 }
0x1101   :  { %2212 = vtanh.f32 %v1788_v49 }
0x1104   :  { %v1770_v60 = vpop.f32.mrf.mxu0 }
0x1107   :  { %v2213_v61 = vpop.eup %2212 }
0x1108   :  { %2105 = vst [vmem:[%s2927_s8 + $0x4] sm:$0x3] %v2213_v61 }
0x110c   :  { %v1848_v10 = vpop.f32.mrf.mxu0 }
0x110d   :  { %v1865_v11 = vadd.f32 %v2789_v1, %v1848_v10 }
0x110f   :  { %v1868_v16 = vadd.f32 %v2861_v46, %v1865_v11 }
0x1111   :  { %2214 = vtanh.f32 %v1868_v16 }
0x1114   :  { %v1850_v56 = vpop.f32.mrf.mxu0 }
0x1117   :  { %v2215_v17 = vpop.eup %2214 }
0x1118   :  { %2111 = vst [vmem:[%s2927_s8 + $0x8] sm:$0x3] %v2215_v17 }
0x111c   :  { %v1928_v18 = vpop.f32.mrf.mxu0 }
0x111d   :  { %v1945_v19 = vadd.f32 %v2856_v43, %v1928_v18 }
0x111f   :  { %v1948_v20 = vadd.f32 %v2861_v46, %v1945_v19 }
0x1121   :  { %2216 = vtanh.f32 %v1948_v20 }
0x1124   :  { %v1930_v26 = vpop.f32.mrf.mxu0 }
0x1127   :  { %v2217_v27 = vpop.eup %2216 }
0x1128   :  { %2117 = vst [vmem:[%s2927_s8 + $0xc] sm:$0x3] %v2217_v27 }
0x1129   :  { %1996 = vsyncpa [#allocation5], 1 }
0x112a   :  { %1997 = vsyncpa [#allocation7], 1 }

</bundles_post_ra>
